<compile_context>
chip_gen: v7x
topology: tpu7x:2x2x1
jax: 0.10.0
libtpu: 0.0.40
codegen_flags: <defaults>
</compile_context>

<pallas_src>
import functools

import jax
import jax.numpy as jnp
from jax.experimental import pallas as pl
from jax.experimental.pallas import tpu as pltpu

_LANE = 128
_MAX_BATCH_TILE = 16                 # 16 * 1280 * 128(lane-padded) * 4B ≈ 10 MiB / buffer
_VMEM_LIMIT_BYTES = 48 * 1024 * 1024  # fits v7x's 64 MiB physical, plenty for v5e/v6e


def _encoder_head_kernel(f_ref, w_ref, b_ref, o_ref):
    # f_ref: [tn, C, HW] native-layout feature tile, w_ref: [C, O_pad],
    # b_ref: [1, O_pad], o_ref: [tn, O_pad] (leading grid dim squeezed out).
    f = f_ref[...].astype(jnp.float32)
    # Global average pool over the spatial (lane) axis: cheap XLU cross-lane reduce.
    # NOTE: 1/HW is taken from the block shape; only valid because the block always
    # spans the full spatial extent (HW is never tiled here).
    inv_hw = jnp.float32(1.0 / f.shape[-1])
    pooled = jnp.sum(f, axis=-1) * inv_hw                         # [tn, C], C lane-dense
    # Linear(1280 -> 120) on the MXU, f32 accumulation, lane-dense padded output.
    out = jnp.dot(pooled, w_ref[...].astype(jnp.float32),
                  preferred_element_type=jnp.float32)             # [tn, O_pad]
    out = out + b_ref[...].astype(jnp.float32)                    # broadcast [1, O_pad]
    o_ref[...] = out.astype(o_ref.dtype)


def prepare_head_params(weight, bias):
    """One-time parameter prep (hoisted out of the hot path): transpose the
    PyTorch nn.Linear weight [O, C] -> [C, O] and zero-pad O (120) to 128 lanes."""
    O, C = weight.shape
    O_pad = _LANE * pl.cdiv(O, _LANE)
    w_p = jnp.zeros((C, O_pad), weight.dtype).at[:, :O].set(weight.T)
    b_p = jnp.zeros((1, O_pad), bias.dtype).at[0, :O].set(bias)
    return w_p, b_p


@functools.partial(jax.jit, static_argnames=("out_features",))
def encoder_head_forward(features, w_p, b_p, *, out_features):
    """features: [N, C, H, W] EfficientNet-b0 feature map (C=1280), native layout;
       w_p: [C, O_pad] pre-transposed/padded weight; b_p: [1, O_pad] padded bias."""
    N, C, H, W = features.shape
    HW = H * W
    O_pad = w_p.shape[1]

    # Free reshape (collapses contiguous minor dims) — no transpose, no extra HBM pass.
    f = features.reshape(N, C, HW)

    # Batch tiling: >= 2 blocks whenever N >= 2 (v7x megacore), capped so the
    # double-buffered lane-padded feature tile stays ~20 MiB.
    tn = min(_MAX_BATCH_TILE, max(1, pl.cdiv(N, 2)))
    num_blocks = pl.cdiv(N, tn)
    # No input padding: the last block may read past row N; those junk rows only
    # produce junk output rows that are sliced off below.

    out = pl.pallas_call(
        _encoder_head_kernel,
        out_shape=jax.ShapeDtypeStruct((num_blocks, tn, O_pad), features.dtype),
        grid=(num_blocks,),
        in_specs=[
            pl.BlockSpec((tn, C, HW), lambda i: (i, 0, 0)),    # stream feature tiles
            pl.BlockSpec((C, O_pad), lambda i: (0, 0)),        # weight stays resident
            pl.BlockSpec((1, O_pad), lambda i: (0, 0)),        # bias stays resident
        ],
        out_specs=pl.BlockSpec((None, tn, O_pad), lambda i: (i, 0, 0)),
        compiler_params=pltpu.CompilerParams(
            dimension_semantics=("parallel",),                 # megacore over batch
            vmem_limit_bytes=_VMEM_LIMIT_BYTES,
        ),
    )(f, w_p, b_p)

    return out.reshape(num_blocks * tn, O_pad)[:N, :out_features]


if __name__ == "__main__":
    key = jax.random.PRNGKey(0)
    k_f, k_w, k_b = jax.random.split(key, 3)

    # EfficientNet-b0 backbone output: 1280 channels, 7x7 spatial map for a 224x224
    # input. Batch of 2 keeps the demo small (and exercises the grid>=2 path).
    N, C, Hf, Wf = 2, 1280, 7, 7
    O = 120

    features = jax.random.normal(k_f, (N, C, Hf, Wf), dtype=jnp.float32)

    # nn.Linear(1280, 120) default init: U(-1/sqrt(fan_in), 1/sqrt(fan_in)).
    bound = 1.0 / (C ** 0.5)
    weight = jax.random.uniform(k_w, (O, C), minval=-bound, maxval=bound,
                                dtype=jnp.float32)
    bias = jax.random.uniform(k_b, (O,), minval=-bound, maxval=bound,
                              dtype=jnp.float32)

    # One-time parameter prep, outside the per-call path.
    w_p, b_p = prepare_head_params(weight, bias)

    out = encoder_head_forward(features, w_p, b_p, out_features=O)
    out = jax.block_until_ready(out)
    assert out.shape == (N, O), out.shape

    # Reference: global avg-pool + flatten + linear in plain JAX.
    ref = jnp.mean(features, axis=(2, 3)) @ weight.T + bias
    assert jnp.allclose(out, ref, atol=5e-3, rtol=5e-3), \
        float(jnp.max(jnp.abs(out - ref)))

    print("KERNEL_OK")
</pallas_src>

<mosaic_0001>
module attributes {stable_mosaic.version = 11 : i64} {
  func.func @_encoder_head_kernel(%arg0: i32, %arg1: memref<1x1280x49xf32, #tpu.memory_space<vmem>>, %arg2: memref<1280x128xf32, #tpu.memory_space<vmem>>, %arg3: memref<1x128xf32, #tpu.memory_space<vmem>>, %arg4: memref<1x1x128xf32, #tpu.memory_space<vmem>>) attributes {dimension_semantics = [#tpu.dimension_semantics<parallel>], iteration_bounds = array<i64: 2>, scalar_prefetch = 0 : i64, scratch_operands = 0 : i64, tpu.core_type = #tpu.core_type<tc>, window_params = [{transform_indices = @transform_0, window_bounds = array<i64: 1, 1280, 49>}, {pipeline_mode = #tpu.pipeline_mode<synchronous>, transform_indices = @transform_1, window_bounds = array<i64: 1280, 128>}, {pipeline_mode = #tpu.pipeline_mode<synchronous>, transform_indices = @transform_2, window_bounds = array<i64: 1, 128>}, {transform_indices = @transform_3, window_bounds = array<i64: 1, 1, 128>}]} {
    %c0 = arith.constant 0 : index
    %c0_0 = arith.constant 0 : index
    %c0_1 = arith.constant 0 : index
    %0 = vector.load %arg1[%c0, %c0_0, %c0_1] : memref<1x1280x49xf32, #tpu.memory_space<vmem>>, vector<1x1280x49xf32>
    %cst = arith.constant dense<0.000000e+00> : vector<1x1280xf32>
    %1 = vector.multi_reduction <add>, %0, %cst [2] : vector<1x1280x49xf32> to vector<1x1280xf32>
    %cst_2 = arith.constant 0.0204081628 : f32
    %2 = vector.broadcast %cst_2 : f32 to vector<1x1280xf32>
    %3 = arith.mulf %1, %2 : vector<1x1280xf32>
    %c0_3 = arith.constant 0 : index
    %c0_4 = arith.constant 0 : index
    %4 = vector.load %arg2[%c0_3, %c0_4] : memref<1280x128xf32, #tpu.memory_space<vmem>>, vector<1280x128xf32>
    %cst_5 = arith.constant dense<0.000000e+00> : vector<1x128xf32>
    %5 = tpu.matmul %3, %4, %cst_5 {dimension_numbers = #tpu.dot_dimension_numbers<[1], [0], [0], [1], [0, 0, 1, 1], [], []>} : vector<1x1280xf32>, vector<1280x128xf32>, vector<1x128xf32> -> vector<1x128xf32>
    %c0_6 = arith.constant 0 : index
    %c0_7 = arith.constant 0 : index
    %6 = vector.load %arg3[%c0_6, %c0_7] : memref<1x128xf32, #tpu.memory_space<vmem>>, vector<1x128xf32>
    %7 = arith.addf %5, %6 : vector<1x128xf32>
    %c0_8 = arith.constant 0 : index
    %c0_9 = arith.constant 0 : index
    %c0_10 = arith.constant 0 : index
    %8 = vector.load %arg4[%c0_8, %c0_9, %c0_10] : memref<1x1x128xf32, #tpu.memory_space<vmem>>, vector<1x1x128xf32>
    %9 = vector.shape_cast %8 : vector<1x1x128xf32> to vector<1x128xf32>
    %10 = vector.shape_cast %7 : vector<1x128xf32> to vector<1x1x128xf32>
    tpu.vector_store %arg4[%c0_8, %c0_9, %c0_10], %10 {strides = array<i32>} : memref<1x1x128xf32, #tpu.memory_space<vmem>>, vector<1x1x128xf32>,
    return
  }
  func.func @transform_0(%arg0: i32) -> (i32, i32, i32) {
    %c0_i32 = arith.constant 0 : i32
    %c0_i32_0 = arith.constant 0 : i32
    %c0_i32_1 = arith.constant 0 : i32
    return %arg0, %c0_i32, %c0_i32_0 : i32, i32, i32
  }
  func.func @transform_1(%arg0: i32) -> (i32, i32) {
    %c0_i32 = arith.constant 0 : i32
    %c0_i32_0 = arith.constant 0 : i32
    %c0_i32_1 = arith.constant 0 : i32
    return %c0_i32, %c0_i32_0 : i32, i32
  }
  func.func @transform_2(%arg0: i32) -> (i32, i32) {
    %c0_i32 = arith.constant 0 : i32
    %c0_i32_0 = arith.constant 0 : i32
    %c0_i32_1 = arith.constant 0 : i32
    return %c0_i32, %c0_i32_0 : i32, i32
  }
  func.func @transform_3(%arg0: i32) -> (i32, i32, i32) {
    %c0_i32 = arith.constant 0 : i32
    %c0_i32_0 = arith.constant 0 : i32
    %c0_i32_1 = arith.constant 0 : i32
    return %arg0, %c0_i32, %c0_i32_0 : i32, i32, i32
  }
}

</mosaic_0001>

<bundles_post_ra>
// kernel: encoder_head_forward.1
= control target key start
LH: loop header
LB: loop body
LE: loop exit
PB: predicated region body
PF: predicated region fallthrough
CT: control target
= control target key end

     0   :  { %8 = vsyncpa [#allocation3], 0  ;;  %s4538_s0 = inlined_call_operand.vmem [shape: f32[2,1280,49], index: 0, kind: input, shape index: {}]   ;;  %s4539_s1 = inlined_call_operand.vmem [shape: f32[1280,128], index: 1, kind: input, shape index: {}]   ;;  %s4540_s2 = inlined_call_operand.vmem [shape: f32[1,128], index: 2, kind: input, shape index: {}]   ;;  %s4541_s3 = inlined_call_operand.hbm [shape: f32[2,1,128], index: 3, kind: output, shape index: {}]  }
   0x1   :  { %10 = vsyncpa [#allocation3 + $0x1], 0  ;;  %s3009_s12 = smov 0   ;;  %s3011_s13 = smov 0  }
   0x2   :  { %s3013_s14 = smov 0   ;;  %s3015_s15 = smov 0  }
   0x3 LB: > { %s3030_s16 = sadd.s32 4294967295, %s2986_s15   ;;  %s2541_s17 = sadd.s32 4294967294, %s2986_s15   ;;  %s2986_s15 = sphi %s3015_s15, %s4559_s15   ;;  %s2982_s14 = sphi %s3013_s14, %s4558_s14   ;;  %s2978_s13 = sphi %s3011_s13, %s4557_s13   ;;  %s2974_s12 = sphi %s3009_s12, %s4556_s12  }
   0x4   : > { %s3034_s18 = sadd.s32 1, %s2986_s15   ;;  %s91_s19 = sadd.s32 1, %s2982_s14 }
   0x5   : > { %s88_s20 = ssub.s32 %s2986_s15, %s3034_s18  ;;  %p101_p0 = scmp.ne.s32.totalorder %s2982_s14, %s2978_s13 }
   0x6   : > { %p89_p1 = scmp.eq.s32.totalorder %s88_s20, 0  ;;  %p102_p2 = scmp.eq.s32.totalorder %s3030_s16, 1 }
   0x7   : > { %p107_p3 = scmp.ne.s32.totalorder %s2978_s13, %s2974_s12  ;;  %p108_p4 = scmp.eq.s32.totalorder %s2541_s17, 1 }
   0x8   : > { %s3045_s21 = scalar_select %p89_p1, %s2982_s14, %s91_s19  }
   0x9   : > { %p3047_p5 = por %p102_p2, %p101_p0  ;;  %p3051_p6 = por %p108_p4, %p107_p3 }
   0xa   : > { %p2544_p7 = scmp.ge.s32.totalorder %s2986_s15, 1  ;;  %p140_p8 = scmp.lt.s32.totalorder %s2986_s15, 3 }
   0xc   : > { %p141_p9 = pnand %p2544_p7, %p140_p8 }
   0xe   : > { %144 = sbr.rel (%p141_p9) target bundleno = 725 (0x2d5), region = 32 }
  0x15   : > { %p163_p10 = scmp.lt.s32.totalorder %s3030_s16, 1  ;;  %vm328_vm0 = vcmask 400384   ;;  %v985_v52 = vld [vmem:[%s4539_s1 + $0x80] sm:$0xff]  ;;  %v986_v53 = vld [vmem:[%s4539_s1 + $0x88] sm:$0xff]  ;;  %v987_v62 = vld [vmem:[%s4539_s1 + $0x90] sm:$0xff]  ;;  %vm1301_vm1 = vcmask 130112  }
  0x16   : > { %v2724_v56 = vpack.c.bf16 %v986_v53, %v985_v52  ;;  %v969_v57 = vld [vmem:[%s4539_s1] sm:$0xff]  ;;  %v970_v58 = vld [vmem:[%s4539_s1 + $0x8] sm:$0xff]  ;;  %v988_v63 = vld [vmem:[%s4539_s1 + $0x98] sm:$0xff]  ;;  %vm1308_vm2 = vcmask 195712   ;;  %vm1315_vm3 = vcmask 261312   ;;  %vm1322_vm4 = vcmask 326912  }
  0x17   : > { %s164_s24 = scalar_select %p163_p10, %s3030_s16, 1  ;;  %v2726_v59 = vpack.c.bf16 %v970_v58, %v969_v57  ;;  %v981_v53 = vld [vmem:[%s4539_s1 + $0x60] sm:$0xff]  ;;  %v999_v58 = vld [vmem:[%s4539_s1 + $0xf0] sm:$0xff]  ;;  %vm1329_vm5 = vcmask 392512   ;;  %vm1336_vm6 = vcmask 458112   ;;  %vm1343_vm7 = vcmask 523712  }
  0x18   : > { %2725 = vmatprep.subr.bf16.mxu0 %v2724_v56  ;;  %vm1350_vm8 = vcmask 589312   ;;  %vm1357_vm9 = vcmask 654912   ;;  %vm1364_vm10 = vcmask 720512   ;;  %vm1371_vm11 = vcmask 786112   ;;  %s161_s11 = sand.u32 1, %s2978_s13   ;;  %s2546_s17 = sshll.u32 %s3030_s16, 4 }
  0x19   : > { %s2884_s25 = smul.u32 1280, %s164_s24  ;;  %2727 = vmatpush3.bf16.msra.mxu0 %v2726_v59  ;;  %v1000_v59 = vld [vmem:[%s4539_s1 + $0xf8] sm:$0xff]  ;;  %vm1378_vm12 = vcmask 851712   ;;  %vm1385_vm13 = vcmask 917312   ;;  %vm1392_vm14 = vcmask 982912   ;;  %vm1399_vm15 = vcmask 1048512  }
  0x1a   : > { %s162_s19 = scalar_lea.vmem [#allocation2], %s161_s11  ;;  %s2474_s26 = scalar_lea.sflag [#allocation3], %s161_s11 }
  0x1b   : > { %s3062_s28 = scalar_lea.vmem %s4538_s0, %s2884_s25  ;;  %s2486_s20 = sshll.u32 %s162_s19, 4  ;;  %s4498_s20 = int_to_ptr.vmem [resolvable:$true] %s2486_s20 }
  0x1c   : > { %v184_v0 = vld [vmem:[%s3062_s28 + $0x80] sm:$0xff]  ;;  %v185_v2 = vld [vmem:[%s3062_s28 + $0x88] sm:$0xff]  ;;  %v186_v8 = vld [vmem:[%s3062_s28 + $0x90] sm:$0xff]  ;;  %s4496_s25 = scalar_lea.hbm %s4541_s3, %s2546_s17  ;;  %s2924_s27 = scalar_lea.vmem %s4498_s20, 16 }
  0x1d   : > { %v168_v1 = vld [vmem:[%s3062_s28] sm:$0xff]  ;;  %v377_v3 = vsel %vm328_vm0, %v184_v0, 0.0  ;;  %v169_v5 = vld [vmem:[%s3062_s28 + $0x8] sm:$0xff]  ;;  %v380_v6 = vsel %vm328_vm0, %v185_v2, 0.0  ;;  %v170_v9 = vld [vmem:[%s3062_s28 + $0x10] sm:$0xff]  ;;  %v383_v10 = vsel %vm328_vm0, %v186_v8, 0.0  ;;  %v2728_v2 = vpack.c.bf16 %v988_v63, %v987_v62  ;;  %p2925_p11 = scmp.ne.s32.totalorder %s4498_s20, %s2924_s27 }
  0x1e   : > { %v329_v4 = vsel %vm328_vm0, %v168_v1, 0.0  ;;  %378 = vadd.xlane.f32.xlu0 %v377_v3  ;;  %v332_v7 = vsel %vm328_vm0, %v169_v5, 0.0  ;;  %v335_v11 = vsel %vm328_vm0, %v170_v9, 0.0  ;;  %v187_v12 = vld [vmem:[%s3062_s28 + $0x98] sm:$0xff]  ;;  %v188_v16 = vld [vmem:[%s3062_s28 + $0xa0] sm:$0xff]  ;;  %v189_v20 = vld [vmem:[%s3062_s28 + $0xa8] sm:$0xff]  ;;  %v2752_v62 = vpack.c.bf16 %v1000_v59, %v999_v58 }
  0x1f   : > { %330 = vadd.xlane.f32.xlu1 %v329_v4  ;;  %v171_v13 = vld [vmem:[%s3062_s28 + $0x18] sm:$0xff]  ;;  %v386_v14 = vsel %vm328_vm0, %v187_v12, 0.0  ;;  %v172_v17 = vld [vmem:[%s3062_s28 + $0x20] sm:$0xff]  ;;  %v389_v18 = vsel %vm328_vm0, %v188_v16, 0.0  ;;  %v173_v21 = vld [vmem:[%s3062_s28 + $0x28] sm:$0xff]  ;;  %v392_v22 = vsel %vm328_vm0, %v189_v20, 0.0  ;;  %2729 = vmatprep.subr.bf16.mxu0 %v2728_v2  ;;  %p2926_p12 = pnand %p2925_p11, %p3047_p5 }
  0x20   : > { %v338_v15 = vsel %vm328_vm0, %v171_v13, 0.0  ;;  %v341_v19 = vsel %vm328_vm0, %v172_v17, 0.0  ;;  %v344_v23 = vsel %vm328_vm0, %v173_v21, 0.0  ;;  %v190_v24 = vld [vmem:[%s3062_s28 + $0xb0] sm:$0xff]  ;;  %v191_v28 = vld [vmem:[%s3062_s28 + $0xb8] sm:$0xff]  ;;  %v192_v32 = vld [vmem:[%s3062_s28 + $0xc0] sm:$0xff] }
  0x21   : > { %v174_v25 = vld [vmem:[%s3062_s28 + $0x30] sm:$0xff]  ;;  %v395_v26 = vsel %vm328_vm0, %v190_v24, 0.0  ;;  %v175_v29 = vld [vmem:[%s3062_s28 + $0x38] sm:$0xff]  ;;  %v398_v30 = vsel %vm328_vm0, %v191_v28, 0.0  ;;  %v176_v33 = vld [vmem:[%s3062_s28 + $0x40] sm:$0xff]  ;;  %v401_v34 = vsel %vm328_vm0, %v192_v32, 0.0  ;;  %p2927_p13 = pneg %p2926_p12 }
  0x22   : > { %381 = vadd.xlane.f32.xlu0 %v380_v6  ;;  %v347_v27 = vsel %vm328_vm0, %v174_v25, 0.0  ;;  %v350_v31 = vsel %vm328_vm0, %v175_v29, 0.0  ;;  %v353_v35 = vsel %vm328_vm0, %v176_v33, 0.0  ;;  %v193_v36 = vld [vmem:[%s3062_s28 + $0xc8] sm:$0xff]  ;;  %v194_v40 = vld [vmem:[%s3062_s28 + $0xd0] sm:$0xff]  ;;  %v195_v44 = vld [vmem:[%s3062_s28 + $0xd8] sm:$0xff] }
  0x23   : > { %333 = vadd.xlane.f32.xlu1 %v332_v7  ;;  %v177_v37 = vld [vmem:[%s3062_s28 + $0x48] sm:$0xff]  ;;  %v404_v38 = vsel %vm328_vm0, %v193_v36, 0.0  ;;  %v178_v41 = vld [vmem:[%s3062_s28 + $0x50] sm:$0xff]  ;;  %v407_v42 = vsel %vm328_vm0, %v194_v40, 0.0  ;;  %v179_v45 = vld [vmem:[%s3062_s28 + $0x58] sm:$0xff]  ;;  %v410_v46 = vsel %vm328_vm0, %v195_v44, 0.0 }
  0x24   : > { %v356_v39 = vsel %vm328_vm0, %v177_v37, 0.0  ;;  %v359_v43 = vsel %vm328_vm0, %v178_v41, 0.0  ;;  %v362_v47 = vsel %vm328_vm0, %v179_v45, 0.0  ;;  %v196_v48 = vld [vmem:[%s3062_s28 + $0xe0] sm:$0xff]  ;;  %v197_v54 = vld [vmem:[%s3062_s28 + $0xe8] sm:$0xff]  ;;  %v198_v0 = vld [vmem:[%s3062_s28 + $0xf0] sm:$0xff] }
  0x25   : > { %v180_v49 = vld [vmem:[%s3062_s28 + $0x60] sm:$0xff]  ;;  %v413_v50 = vsel %vm328_vm0, %v196_v48, 0.0  ;;  %v181_v55 = vld [vmem:[%s3062_s28 + $0x68] sm:$0xff]  ;;  %v416_v60 = vsel %vm328_vm0, %v197_v54, 0.0  ;;  %v182_v1 = vld [vmem:[%s3062_s28 + $0x70] sm:$0xff]  ;;  %v419_v6 = vsel %vm328_vm0, %v198_v0, 0.0 }
  0x26   : > { %384 = vadd.xlane.f32.xlu0 %v383_v10  ;;  %v365_v51 = vsel %vm328_vm0, %v180_v49, 0.0  ;;  %v368_v61 = vsel %vm328_vm0, %v181_v55, 0.0  ;;  %v971_v3 = vld [vmem:[%s4539_s1 + $0x10] sm:$0xff]  ;;  %v972_v4 = vld [vmem:[%s4539_s1 + $0x18] sm:$0xff]  ;;  %v371_v7 = vsel %vm328_vm0, %v182_v1, 0.0  ;;  %v989_v8 = vld [vmem:[%s4539_s1 + $0xa0] sm:$0xff] }
  0x27   : > { %336 = vadd.xlane.f32.xlu1 %v335_v11  ;;  %v2730_v5 = vpack.c.bf16 %v972_v4, %v971_v3  ;;  %v990_v9 = vld [vmem:[%s4539_s1 + $0xa8] sm:$0xff]  ;;  %v199_v10 = vld [vmem:[%s3062_s28 + $0xf8] sm:$0xff]  ;;  %v973_v13 = vld [vmem:[%s4539_s1 + $0x20] sm:$0xff]  ;;  %s2988_s16 = smov [#allocation2]  }
  0x28   : > { %v183_v11 = vld [vmem:[%s3062_s28 + $0x78] sm:$0xff]  ;;  %v2732_v12 = vpack.c.bf16 %v990_v9, %v989_v8  ;;  %v422_v16 = vsel %vm328_vm0, %v199_v10, 0.0  ;;  %v216_v20 = vld [vmem:[%s3062_s28 + $0x180] sm:$0xff]  ;;  %v217_v21 = vld [vmem:[%s3062_s28 + $0x188] sm:$0xff]  ;;  %s2928_s29 = sshll.u32 %s2988_s16, 4  ;;  %s2929_s29 = int_to_ptr.vmem [resolvable:$false] %s2928_s29 }
  0x29   : > { %2731 = vmatpush3.bf16.msra.mxu0 %v2730_v5  ;;  %v374_v17 = vsel %vm328_vm0, %v183_v11, 0.0  ;;  %v976_v24 = vld [vmem:[%s4539_s1 + $0x38] sm:$0xff]  ;;  %v993_v28 = vld [vmem:[%s4539_s1 + $0xc0] sm:$0xff]  ;;  %v994_v29 = vld [vmem:[%s4539_s1 + $0xc8] sm:$0xff]  ;;  %s2930_s30 = scalar_lea.vmem %s2929_s29, 32  ;;  %p2931_p0 = scmp.lt.s32.totalorder %s4498_s20, %s2929_s29 }
  0x2a   : > { %387 = vadd.xlane.f32.xlu0 %v386_v14  ;;  %v974_v14 = vld [vmem:[%s4539_s1 + $0x28] sm:$0xff]  ;;  %2733 = vmatprep.subr.bf16.mxu0 %v2732_v12  ;;  %v2740_v32 = vpack.c.bf16 %v994_v29, %v993_v28  ;;  %v977_v33 = vld [vmem:[%s4539_s1 + $0x40] sm:$0xff]  ;;  %v218_v40 = vld [vmem:[%s3062_s28 + $0x190] sm:$0xff]  ;;  %p2932_p1 = scmp.lt.s32.totalorder %s2930_s30, %s2924_s27 }
  0x2b   : > { %339 = vadd.xlane.f32.xlu1 %v338_v15  ;;  %v2734_v15 = vpack.c.bf16 %v974_v14, %v973_v13  ;;  %v202_v41 = vld [vmem:[%s3062_s28 + $0x110] sm:$0xff]  ;;  %v980_v44 = vld [vmem:[%s4539_s1 + $0x58] sm:$0xff]  ;;  %v997_v48 = vld [vmem:[%s4539_s1 + $0xe0] sm:$0xff] }
  0x2c   : > { %v998_v49 = vld [vmem:[%s4539_s1 + $0xe8] sm:$0xff]  ;;  %v983_v63 = vld [vmem:[%s4539_s1 + $0x70] sm:$0xff]  ;;  %v984_v0 = vld [vmem:[%s4539_s1 + $0x78] sm:$0xff]  ;;  %p2933_p2 = por %p2932_p1, %p2931_p0 }
  0x2d   : > { %2735 = vmatpush3.bf16.msra.mxu0 %v2734_v15  ;;  %v2748_v52 = vpack.c.bf16 %v998_v49, %v997_v48  ;;  %v982_v54 = vld [vmem:[%s4539_s1 + $0x68] sm:$0xff]  ;;  %v2754_v1 = vpack.c.bf16 %v984_v0, %v983_v63  ;;  %v220_v4 = vld [vmem:[%s3062_s28 + $0x1a0] sm:$0xff]  ;;  %v250_v9 = vld [vmem:[%s3062_s28 + $0x290] sm:$0xff] }
  0x2e   : > { %390 = vadd.xlane.f32.xlu0 %v389_v18  ;;  %v991_v18 = vld [vmem:[%s4539_s1 + $0xb0] sm:$0xff]  ;;  %v2750_v55 = vpack.c.bf16 %v982_v54, %v981_v53  ;;  %v232_v5 = vld [vmem:[%s3062_s28 + $0x200] sm:$0xff]  ;;  %v233_v8 = vld [vmem:[%s3062_s28 + $0x208] sm:$0xff]  ;;  %v575_v11 = vsel %vm328_vm0, %v250_v9, 0.0  ;;  %p2934_p3 = pnand %p2933_p2, %p2927_p13 }
  0x2f   : > { %342 = vadd.xlane.f32.xlu1 %v341_v19  ;;  %v992_v19 = vld [vmem:[%s4539_s1 + $0xb8] sm:$0xff]  ;;  %v524_v10 = vsel %vm328_vm0, %v233_v8, 0.0  ;;  %v204_v12 = vld [vmem:[%s3062_s28 + $0x120] sm:$0xff]  ;;  %v221_v13 = vld [vmem:[%s3062_s28 + $0x1a8] sm:$0xff] }
  0x30   : > { %v437_v14 = vsel %vm328_vm0, %v204_v12, 0.0  ;;  %v488_v15 = vsel %vm328_vm0, %v221_v13, 0.0  ;;  %v206_v28 = vld [vmem:[%s3062_s28 + $0x130] sm:$0xff]  ;;  %v223_v29 = vld [vmem:[%s3062_s28 + $0x1b8] sm:$0xff]  ;;  %v240_v0 = vld [vmem:[%s3062_s28 + $0x240] sm:$0xff] }
  0x31   : > { %v238_v48 = vld [vmem:[%s3062_s28 + $0x230] sm:$0xff]  ;;  %v255_v49 = vld [vmem:[%s3062_s28 + $0x2b8] sm:$0xff]  ;;  %v241_v12 = vld [vmem:[%s3062_s28 + $0x248] sm:$0xff] }
  0x32   : > { %393 = vadd.xlane.f32.xlu0 %v392_v22  ;;  %v2736_v22 = vpack.c.bf16 %v992_v19, %v991_v18  ;;  %v226_v53 = vld [vmem:[%s3062_s28 + $0x1d0] sm:$0xff] }
  0x33   : > { %345 = vadd.xlane.f32.xlu1 %v344_v23  ;;  %v975_v23 = vld [vmem:[%s4539_s1 + $0x30] sm:$0xff] }
  0x34   : > { %v2738_v25 = vpack.c.bf16 %v976_v24, %v975_v23  ;;  %2737 = vmatprep.subr.bf16.mxu0 %v2736_v22  ;;  %v235_v24 = vld [vmem:[%s3062_s28 + $0x218] sm:$0xff]  ;;  %v258_v13 = vld [vmem:[%s3062_s28 + $0x2d0] sm:$0xff] }
  0x36   : > { %396 = vadd.xlane.f32.xlu0 %v395_v26  ;;  %v473_v26 = vsel %vm328_vm0, %v216_v20, 0.0  ;;  %2739 = vmatpush3.bf16.msra.mxu0 %v2738_v25  ;;  %v205_v20 = vld [vmem:[%s3062_s28 + $0x128] sm:$0xff]  ;;  %v252_v25 = vld [vmem:[%s3062_s28 + $0x2a0] sm:$0xff] }
  0x37   : > { %348 = vadd.xlane.f32.xlu1 %v347_v27  ;;  %v476_v27 = vsel %vm328_vm0, %v217_v21, 0.0  ;;  %2741 = vmatprep.subr.bf16.mxu0 %v2740_v32  ;;  %v222_v21 = vld [vmem:[%s3062_s28 + $0x1b0] sm:$0xff]  ;;  %v440_v22 = vsel %vm328_vm0, %v205_v20, 0.0  ;;  %v236_v32 = vld [vmem:[%s3062_s28 + $0x220] sm:$0xff] }
  0x38   : > { %v491_v23 = vsel %vm328_vm0, %v222_v21, 0.0 }
  0x3a   : > { %399 = vadd.xlane.f32.xlu0 %v398_v30  ;;  %v200_v30 = vld [vmem:[%s3062_s28 + $0x100] sm:$0xff] }
  0x3b   : > { %351 = vadd.xlane.f32.xlu1 %v350_v31  ;;  %v201_v31 = vld [vmem:[%s3062_s28 + $0x108] sm:$0xff]  ;;  %v425_v36 = vsel %vm328_vm0, %v200_v30, 0.0  ;;  %v443_v30 = vsel %vm328_vm0, %v206_v28, 0.0 }
  0x3c   : > { %v428_v37 = vsel %vm328_vm0, %v201_v31, 0.0  ;;  %v494_v31 = vsel %vm328_vm0, %v223_v29, 0.0 }
  0x3e   : > { %402 = vadd.xlane.f32.xlu0 %v401_v34  ;;  %v978_v34 = vld [vmem:[%s4539_s1 + $0x48] sm:$0xff] }
  0x3f   : > { %354 = vadd.xlane.f32.xlu1 %v353_v35  ;;  %v2742_v35 = vpack.c.bf16 %v978_v34, %v977_v33  ;;  %v253_v33 = vld [vmem:[%s3062_s28 + $0x2a8] sm:$0xff]  ;;  %v533_v34 = vsel %vm328_vm0, %v236_v32, 0.0  ;;  %v230_v32 = vld [vmem:[%s3062_s28 + $0x1f0] sm:$0xff] }
  0x41   : > { %2743 = vmatpush3.bf16.msra.mxu0 %v2742_v35  ;;  %v584_v35 = vsel %vm328_vm0, %v253_v33, 0.0 }
  0x42   : > { %405 = vadd.xlane.f32.xlu0 %v404_v38  ;;  %v995_v38 = vld [vmem:[%s4539_s1 + $0xd0] sm:$0xff] }
  0x43   : > { %357 = vadd.xlane.f32.xlu1 %v356_v39  ;;  %v996_v39 = vld [vmem:[%s4539_s1 + $0xd8] sm:$0xff] }
  0x46   : > { %408 = vadd.xlane.f32.xlu0 %v407_v42  ;;  %v2744_v42 = vpack.c.bf16 %v996_v39, %v995_v38 }
  0x47   : > { %360 = vadd.xlane.f32.xlu1 %v359_v43  ;;  %v979_v43 = vld [vmem:[%s4539_s1 + $0x50] sm:$0xff] }
  0x48   : > { %v2746_v45 = vpack.c.bf16 %v980_v44, %v979_v43  ;;  %2745 = vmatprep.subr.bf16.mxu0 %v2744_v42  ;;  %v208_v44 = vld [vmem:[%s3062_s28 + $0x140] sm:$0xff] }
  0x4a   : > { %411 = vadd.xlane.f32.xlu0 %v410_v46  ;;  %v479_v46 = vsel %vm328_vm0, %v218_v40, 0.0  ;;  %2747 = vmatpush3.bf16.msra.mxu0 %v2746_v45  ;;  %v237_v40 = vld [vmem:[%s3062_s28 + $0x228] sm:$0xff] }
  0x4b   : > { %363 = vadd.xlane.f32.xlu1 %v362_v47  ;;  %v431_v47 = vsel %vm328_vm0, %v202_v41, 0.0  ;;  %2749 = vmatprep.subr.bf16.mxu0 %v2748_v52  ;;  %v254_v41 = vld [vmem:[%s3062_s28 + $0x2b0] sm:$0xff]  ;;  %v536_v42 = vsel %vm328_vm0, %v237_v40, 0.0  ;;  %v225_v45 = vld [vmem:[%s3062_s28 + $0x1c8] sm:$0xff] }
  0x4c   : > { %v587_v43 = vsel %vm328_vm0, %v254_v41, 0.0  ;;  %v209_v52 = vld [vmem:[%s3062_s28 + $0x148] sm:$0xff] }
  0x4d   : > { %v452_v54 = vsel %vm328_vm0, %v209_v52, 0.0  ;;  %v1018_v52 = vld [vmem:[%s4539_s1 + $0x188] sm:$0xff] }
  0x4e   : > { %414 = vadd.xlane.f32.xlu0 %v413_v50  ;;  %v219_v50 = vld [vmem:[%s3062_s28 + $0x198] sm:$0xff]  ;;  %2751 = vmatpush3.bf16.msra.mxu0 %v2750_v55  ;;  %v503_v55 = vsel %vm328_vm0, %v226_v53, 0.0 }
  0x4f   : > { %366 = vadd.xlane.f32.xlu1 %v365_v51  ;;  %v248_v51 = vld [vmem:[%s3062_s28 + $0x280] sm:$0xff]  ;;  %v482_v56 = vsel %vm328_vm0, %v219_v50, 0.0  ;;  %2753 = vmatprep.subr.bf16.mxu0 %v2752_v62  ;;  %v539_v50 = vsel %vm328_vm0, %v238_v48, 0.0 }
  0x50   : > { %v569_v57 = vsel %vm328_vm0, %v248_v51, 0.0  ;;  %v590_v51 = vsel %vm328_vm0, %v255_v49, 0.0 }
  0x52   : > { %417 = vadd.xlane.f32.xlu0 %v416_v60  ;;  %v249_v60 = vld [vmem:[%s3062_s28 + $0x288] sm:$0xff]  ;;  %2755 = vmatpush3.bf16.msra.mxu0 %v2754_v1 }
  0x53   : > { %369 = vadd.xlane.f32.xlu1 %v368_v61  ;;  %v203_v61 = vld [vmem:[%s3062_s28 + $0x118] sm:$0xff]  ;;  %v572_v2 = vsel %vm328_vm0, %v249_v60, 0.0  ;;  %v210_v60 = vld [vmem:[%s3062_s28 + $0x150] sm:$0xff]  ;;  %v257_v1 = vld [vmem:[%s3062_s28 + $0x2c8] sm:$0xff] }
  0x54   : > { %v434_v3 = vsel %vm328_vm0, %v203_v61, 0.0  ;;  %v227_v61 = vld [vmem:[%s3062_s28 + $0x1d8] sm:$0xff]  ;;  %v455_v62 = vsel %vm328_vm0, %v210_v60, 0.0  ;;  %v244_v60 = vld [vmem:[%s3062_s28 + $0x260] sm:$0xff] }
  0x55   : > { %v506_v63 = vsel %vm328_vm0, %v227_v61, 0.0 }
  0x56   : > { %420 = vadd.xlane.f32.xlu0 %v419_v6  ;;  %v485_v6 = vsel %vm328_vm0, %v220_v4, 0.0  ;;  %v545_v4 = vsel %vm328_vm0, %v240_v0, 0.0 }
  0x57   : > { %372 = vadd.xlane.f32.xlu1 %v371_v7  ;;  %v521_v7 = vsel %vm328_vm0, %v232_v5, 0.0  ;;  %v596_v5 = vsel %vm328_vm0, %v257_v1, 0.0 }
  0x5a   : > { %423 = vadd.xlane.f32.xlu0 %v422_v16  ;;  %v234_v16 = vld [vmem:[%s3062_s28 + $0x210] sm:$0xff] }
  0x5b   : > { %375 = vadd.xlane.f32.xlu1 %v374_v17  ;;  %v251_v17 = vld [vmem:[%s3062_s28 + $0x298] sm:$0xff]  ;;  %v527_v18 = vsel %vm328_vm0, %v234_v16, 0.0  ;;  %v548_v16 = vsel %vm328_vm0, %v241_v12, 0.0 }
  0x5c   : > { %v578_v19 = vsel %vm328_vm0, %v251_v17, 0.0  ;;  %v599_v17 = vsel %vm328_vm0, %v258_v13, 0.0 }
  0x5e   : > { %474 = vadd.xlane.f32.xlu0 %v473_v26  ;;  %v530_v26 = vsel %vm328_vm0, %v235_v24, 0.0  ;;  %v242_v24 = vld [vmem:[%s3062_s28 + $0x250] sm:$0xff] }
  0x5f   : > { %477 = vadd.xlane.f32.xlu1 %v476_v27  ;;  %v581_v27 = vsel %vm328_vm0, %v252_v25, 0.0  ;;  %v259_v25 = vld [vmem:[%s3062_s28 + $0x2d8] sm:$0xff]  ;;  %v551_v28 = vsel %vm328_vm0, %v242_v24, 0.0 }
  0x60   : > { %v602_v29 = vsel %vm328_vm0, %v259_v25, 0.0 }
  0x62   : > { %426 = vadd.xlane.f32.xlu0 %v425_v36  ;;  %v207_v36 = vld [vmem:[%s3062_s28 + $0x138] sm:$0xff] }
  0x63   : > { %429 = vadd.xlane.f32.xlu1 %v428_v37  ;;  %v224_v37 = vld [vmem:[%s3062_s28 + $0x1c0] sm:$0xff]  ;;  %v446_v38 = vsel %vm328_vm0, %v207_v36, 0.0  ;;  %v515_v36 = vsel %vm328_vm0, %v230_v32, 0.0  ;;  %v557_v32 = vsel %vm328_vm0, %v244_v60, 0.0  ;;  %v1022_v60 = vld [vmem:[%s4539_s1 + $0x1a8] sm:$0xff] }
  0x64   : > { %v497_v39 = vsel %vm328_vm0, %v224_v37, 0.0 }
  0x66   : > { %480 = vadd.xlane.f32.xlu0 %v479_v46  ;;  %v449_v46 = vsel %vm328_vm0, %v208_v44, 0.0 }
  0x67   : > { %432 = vadd.xlane.f32.xlu1 %v431_v47  ;;  %v500_v47 = vsel %vm328_vm0, %v225_v45, 0.0 }
  0x6a   : > { %483 = vadd.xlane.f32.xlu0 %v482_v56  ;;  %v239_v56 = vld [vmem:[%s3062_s28 + $0x238] sm:$0xff] }
  0x6b   : > { %570 = vadd.xlane.f32.xlu1 %v569_v57  ;;  %v256_v57 = vld [vmem:[%s3062_s28 + $0x2c0] sm:$0xff]  ;;  %v542_v58 = vsel %vm328_vm0, %v239_v56, 0.0 }
  0x6c   : > { %v593_v59 = vsel %vm328_vm0, %v256_v57, 0.0  ;;  %v1001_v57 = vld [vmem:[%s4539_s1 + $0x100] sm:$0xff] }
  0x6e   : > { %573 = vadd.xlane.f32.xlu0 %v572_v2 }
  0x6f   : > { %435 = vadd.xlane.f32.xlu1 %v434_v3 }
  0x72   : > { %486 = vadd.xlane.f32.xlu0 %v485_v6  ;;  %v211_v6 = vld [vmem:[%s3062_s28 + $0x158] sm:$0xff] }
  0x73   : > { %522 = vadd.xlane.f32.xlu1 %v521_v7  ;;  %v228_v7 = vld [vmem:[%s3062_s28 + $0x1e0] sm:$0xff] }
  0x76   : > { %525 = vadd.xlane.f32.xlu0 %v524_v10  ;;  %v458_v10 = vsel %vm328_vm0, %v211_v6, 0.0  ;;  %v215_v6 = vld [vmem:[%s3062_s28 + $0x178] sm:$0xff] }
  0x77   : > { %576 = vadd.xlane.f32.xlu1 %v575_v11  ;;  %v509_v11 = vsel %vm328_vm0, %v228_v7, 0.0  ;;  %v245_v7 = vld [vmem:[%s3062_s28 + $0x268] sm:$0xff] }
  0x7a   : > { %438 = vadd.xlane.f32.xlu0 %v437_v14 }
  0x7b   : > { %489 = vadd.xlane.f32.xlu1 %v488_v15 }
  0x7e   : > { %528 = vadd.xlane.f32.xlu0 %v527_v18  ;;  %v212_v18 = vld [vmem:[%s3062_s28 + $0x160] sm:$0xff] }
  0x7f   : > { %579 = vadd.xlane.f32.xlu1 %v578_v19  ;;  %v229_v19 = vld [vmem:[%s3062_s28 + $0x1e8] sm:$0xff] }
  0x82   : > { %441 = vadd.xlane.f32.xlu0 %v440_v22  ;;  %v461_v22 = vsel %vm328_vm0, %v212_v18, 0.0  ;;  %v262_v18 = vld [vmem:[%s3062_s28 + $0x2f0] sm:$0xff] }
  0x83   : > { %492 = vadd.xlane.f32.xlu1 %v491_v23  ;;  %v512_v23 = vsel %vm328_vm0, %v229_v19, 0.0  ;;  %v1019_v19 = vld [vmem:[%s4539_s1 + $0x190] sm:$0xff] }
  0x86   : > { %531 = vadd.xlane.f32.xlu0 %v530_v26 }
  0x87   : > { %582 = vadd.xlane.f32.xlu1 %v581_v27 }
  0x8a   : > { %444 = vadd.xlane.f32.xlu0 %v443_v30  ;;  %v1290_v30 = vlaneseq }
  0x8b   : > { %495 = vadd.xlane.f32.xlu1 %v494_v31  ;;  %v213_v31 = vld [vmem:[%s3062_s28 + $0x168] sm:$0xff] }
  0x8c   : > { %v3352_v37 = vand.u32 127, %v1290_v30  ;;  %v3356_v40 = vshrl.u32 %v1290_v30, 7  ;;  %v1003_v30 = vld [vmem:[%s4539_s1 + $0x110] sm:$0xff] }
  0x8e   : > { %534 = vadd.xlane.f32.xlu0 %v533_v34  ;;  %v1296_v41 = vadd.s32 4294967288, %v3352_v37  ;;  %v1317_v44 = vadd.s32 4294967264, %v3352_v37  ;;  %v1324_v45 = vadd.s32 4294967256, %v3352_v37  ;;  %v1331_v53 = vadd.s32 4294967248, %v3352_v37 }
  0x8f   : > { %585 = vadd.xlane.f32.xlu1 %v584_v35  ;;  %v464_v35 = vsel %vm328_vm0, %v213_v31, 0.0  ;;  %v1345_v56 = vadd.s32 4294967232, %v3352_v37  ;;  %v1004_v31 = vld [vmem:[%s4539_s1 + $0x118] sm:$0xff] }
  0x90   : > { %v3425_v24 = vsub.s32 %v1331_v53, %v3356_v40 }
  0x92   : > { %447 = vadd.xlane.f32.xlu0 %v446_v38  ;;  %v243_v38 = vld [vmem:[%s3062_s28 + $0x258] sm:$0xff] }
  0x93   : > { %498 = vadd.xlane.f32.xlu1 %v497_v39  ;;  %v260_v39 = vld [vmem:[%s3062_s28 + $0x2e0] sm:$0xff]  ;;  %v554_v48 = vsel %vm328_vm0, %v243_v38, 0.0  ;;  %v247_v38 = vld [vmem:[%s3062_s28 + $0x278] sm:$0xff] }
  0x94   : > { %v605_v49 = vsel %vm328_vm0, %v260_v39, 0.0 }
  0x96   : > { %537 = vadd.xlane.f32.xlu0 %v536_v42  ;;  %v1303_v42 = vadd.s32 4294967280, %v3352_v37 }
  0x97   : > { %588 = vadd.xlane.f32.xlu1 %v587_v43  ;;  %v1310_v43 = vadd.s32 4294967272, %v3352_v37 }
  0x98   : > { %v3395_v0 = vsub.s32 %v1303_v42, %v3356_v40 }
  0x99   : > { %v3398_v1 = vsub.s32 %v1310_v43, %v3356_v40  ;;  %v3448_v43 = vsel %vm328_vm0, %v215_v6, 0.0  ;;  %v1005_v6 = vld [vmem:[%s4539_s1 + $0x120] sm:$0xff] }
  0x9a   : > { %450 = vadd.xlane.f32.xlu0 %v449_v46  ;;  %4550 = vst [vmem:[#allocation5_spill] sm:$0xff] %v3395_v0 }
  0x9b   : > { %501 = vadd.xlane.f32.xlu1 %v500_v47  ;;  %4551 = vst [vmem:[#allocation6_spill] sm:$0xff] %v3398_v1 }
  0x9e   : > { %540 = vadd.xlane.f32.xlu0 %v539_v50  ;;  %v214_v50 = vld [vmem:[%s3062_s28 + $0x170] sm:$0xff] }
  0x9f   : > { %591 = vadd.xlane.f32.xlu1 %v590_v51  ;;  %v1017_v51 = vld [vmem:[%s4539_s1 + $0x180] sm:$0xff]  ;;  %v467_v13 = vsel %vm328_vm0, %v214_v50, 0.0 }
  0xa0   : > { %v2756_v61 = vpack.c.bf16 %v1018_v52, %v1017_v51  ;;  %v264_v50 = vld [vmem:[%s3062_s28 + $0x300] sm:$0xff] }
  0xa2   : > { %453 = vadd.xlane.f32.xlu0 %v452_v54  ;;  %v1338_v54 = vadd.s32 4294967240, %v3352_v37  ;;  %2757 = vmatprep.subr.bf16.mxu1 %v2756_v61 }
  0xa3   : > { %504 = vadd.xlane.f32.xlu1 %v503_v55  ;;  %v231_v55 = vld [vmem:[%s3062_s28 + $0x1f8] sm:$0xff] }
  0xa4   : > { %v3428_v25 = vsub.s32 %v1338_v54, %v3356_v40 }
  0xa6   : > { %543 = vadd.xlane.f32.xlu0 %v542_v58  ;;  %v1002_v58 = vld [vmem:[%s4539_s1 + $0x108] sm:$0xff] }
  0xa7   : > { %594 = vadd.xlane.f32.xlu1 %v593_v59  ;;  %v3388_v59 = vsub.s32 %v3352_v37, %v3356_v40 }
  0xaa   : > { %456 = vadd.xlane.f32.xlu0 %v455_v62  ;;  %v2758_v62 = vpack.c.bf16 %v1002_v58, %v1001_v57  ;;  %v265_v57 = vld [vmem:[%s3062_s28 + $0x308] sm:$0xff]  ;;  %v1021_v58 = vld [vmem:[%s4539_s1 + $0x1a0] sm:$0xff] }
  0xab   : > { %507 = vadd.xlane.f32.xlu1 %v506_v63  ;;  %v3306_v2 = vpop.xlane.xlu0 %378  ;;  %v3392_v63 = vsub.s32 %v1296_v41, %v3356_v40  ;;  %v2762_v41 = vpack.c.bf16 %v1004_v31, %v1003_v30  ;;  %v3508_v30 = vsel %vm328_vm0, %v265_v57, 0.0  ;;  %v282_v31 = vld [vmem:[%s3062_s28 + $0x390] sm:$0xff] }
  0xac   : > { %v3308_v3 = vpop.xlane.xlu1 %330  ;;  %2759 = vmatpush3.bf16.msra.mxu1 %v2758_v62  ;;  %v3482_v62 = vsel %vm328_vm0, %v247_v38, 0.0  ;;  %v1394_v38 = vadd.s32 4294967176, %v3352_v37 }
  0xae   : > { %546 = vadd.xlane.f32.xlu0 %v545_v4  ;;  %v261_v4 = vld [vmem:[%s3062_s28 + $0x2e8] sm:$0xff] }
  0xaf   : > { %597 = vadd.xlane.f32.xlu1 %v596_v5  ;;  %v3314_v8 = vpop.xlane.xlu0 %381  ;;  %v1352_v5 = vadd.s32 4294967224, %v3352_v37 }
  0xb0   : > { %v3316_v9 = vpop.xlane.xlu1 %333 }
  0xb1   : > { %v3445_v42 = vsub.s32 %v1352_v5, %v3356_v40  ;;  %v1387_v5 = vadd.s32 4294967184, %v3352_v37 }
  0xb2   : > { %459 = vadd.xlane.f32.xlu0 %v458_v10  ;;  %v3405_v10 = vsub.s32 %v1317_v44, %v3356_v40  ;;  %v3451_v44 = vsel %vm328_vm0, %v245_v7, 0.0  ;;  %v1006_v7 = vld [vmem:[%s4539_s1 + $0x128] sm:$0xff] }
  0xb3   : > { %510 = vadd.xlane.f32.xlu1 %v509_v11  ;;  %v3322_v14 = vpop.xlane.xlu0 %384 }
  0xb4   : > { %v3324_v15 = vpop.xlane.xlu1 %336  ;;  %4552 = vst [vmem:[#allocation7_spill] sm:$0xff] %v3405_v10  ;;  %v827_v57 = vmul.f32 0.020408163, %v3322_v14  ;;  %v3546_v14 = vsel %vm328_vm0, %v282_v31, 0.0 }
  0xb6   : > { %549 = vadd.xlane.f32.xlu0 %v548_v16  ;;  %v518_v16 = vsel %vm328_vm0, %v231_v55, 0.0  ;;  %v1366_v55 = vadd.s32 4294967208, %v3352_v37 }
  0xb7   : > { %600 = vadd.xlane.f32.xlu1 %v599_v17  ;;  %v3330_v20 = vpop.xlane.xlu0 %387  ;;  %v1359_v17 = vadd.s32 4294967216, %v3352_v37 }
  0xb8   : > { %v3332_v21 = vpop.xlane.xlu1 %339 }
  0xb9   : > { %v3464_v53 = vsub.s32 %v1359_v17, %v3356_v40  ;;  %v2764_v17 = vpack.c.bf16 %v1022_v60, %v1021_v58  ;;  %v1007_v58 = vld [vmem:[%s4539_s1 + $0x130] sm:$0xff] }
  0xba   : > { %462 = vadd.xlane.f32.xlu0 %v461_v22  ;;  %v1020_v22 = vld [vmem:[%s4539_s1 + $0x198] sm:$0xff] }
  0xbb   : > { %513 = vadd.xlane.f32.xlu1 %v512_v23  ;;  %v3338_v26 = vpop.xlane.xlu0 %390  ;;  %v3422_v23 = vsub.s32 %v1324_v45, %v3356_v40  ;;  %v2760_v39 = vpack.c.bf16 %v1020_v22, %v1019_v19  ;;  %v3454_v45 = vsel %vm328_vm0, %v262_v18, 0.0  ;;  %v2766_v18 = vpack.c.bf16 %v1006_v7, %v1005_v6  ;;  %v1049_v19 = vld [vmem:[%s4539_s1 + $0x280] sm:$0xff]  ;;  %v1050_v22 = vld [vmem:[%s4539_s1 + $0x288] sm:$0xff] }
  0xbc   : > { %v3340_v27 = vpop.xlane.xlu1 %342  ;;  %v809_v6 = vmul.f32 0.020408163, %v3308_v3  ;;  %v811_v7 = vmul.f32 0.020408163, %v3324_v15  ;;  %v829_v3 = vmul.f32 0.020408163, %v3338_v26 }
  0xbd   : > { %2761 = vmatprep.subr.bf16.mxu1 %v2760_v39  ;;  %v2788_v39 = vpack.c.bf16 %v1050_v22, %v1049_v19  ;;  %v283_v19 = vld [vmem:[%s3062_s28 + $0x398] sm:$0xff] }
  0xbe   : > { %552 = vadd.xlane.f32.xlu0 %v551_v28  ;;  %v3431_v28 = vsub.s32 %v1345_v56, %v3356_v40  ;;  %v1373_v56 = vadd.s32 4294967200, %v3352_v37  ;;  %2763 = vmatpush3.bf16.msra.mxu1 %v2762_v41  ;;  %v825_v41 = vmul.f32 0.020408163, %v3306_v2  ;;  %v1024_v2 = vld [vmem:[%s4539_s1 + $0x1b8] sm:$0xff] }
  0xbf   : > { %603 = vadd.xlane.f32.xlu1 %v602_v29  ;;  %v3346_v33 = vpop.xlane.xlu0 %393  ;;  %v246_v29 = vld [vmem:[%s3062_s28 + $0x270] sm:$0xff]  ;;  %2765 = vmatprep.subr.bf16.mxu1 %v2764_v17  ;;  %v828_v17 = vmul.f32 0.020408163, %v3330_v20 }
  0xc0   : > { %v3348_v34 = vpop.xlane.xlu1 %345  ;;  %v3467_v54 = vsel %vm328_vm0, %v246_v29, 0.0  ;;  %v3505_v29 = vsel %vm328_vm0, %v264_v50, 0.0  ;;  %v3523_v50 = vsub.s32 %v1373_v56, %v3356_v40  ;;  %v3537_v56 = vsub.s32 %v1387_v5, %v3356_v40  ;;  %2789 = vmatprep.subr.bf16.mxu0 %v2788_v39  ;;  %v1009_v39 = vld [vmem:[%s4539_s1 + $0x140] sm:$0xff] }
  0xc1   : > { %v1404_v22 = vrot.slane %v825_v41, %v3388_v59  ;;  %v830_v26 = vmul.f32 0.020408163, %v3346_v33  ;;  %v1010_v41 = vld [vmem:[%s4539_s1 + $0x148] sm:$0xff]  ;;  %v1418_v33 = vrot.slane %v828_v17, %v3398_v1 }
  0xc2   : > { %465 = vadd.xlane.f32.xlu0 %v464_v35  ;;  %v608_v35 = vsel %vm328_vm0, %v261_v4, 0.0  ;;  %v1380_v4 = vadd.s32 4294967192, %v3352_v37  ;;  %v1023_v37 = vld [vmem:[%s4539_s1 + $0x1b0] sm:$0xff]  ;;  %2767 = vmatpush3.bf16.msra.mxu1 %v2766_v18  ;;  %v3557_v18 = vsub.s32 %v1394_v38, %v3356_v40  ;;  %v1413_v38 = vrot.slane %v827_v57, %v3395_v0 }
  0xc3   : > { %516 = vadd.xlane.f32.xlu1 %v515_v36  ;;  %v3363_v46 = vpop.xlane.xlu0 %396  ;;  %v263_v36 = vld [vmem:[%s3062_s28 + $0x2f8] sm:$0xff]  ;;  %v1295_v57 = vrot.slane %v809_v6, %v3388_v59  ;;  %v3598_v6 = vsel %vm328_vm0, %v283_v19, 0.0  ;;  %v1011_v19 = vld [vmem:[%s4539_s1 + $0x150] sm:$0xff] }
  0xc4   : > { %v3365_v47 = vpop.xlane.xlu1 %348  ;;  %v3479_v61 = vsel %vm328_vm0, %v263_v36, 0.0  ;;  %v266_v36 = vld [vmem:[%s3062_s28 + $0x310] sm:$0xff] }
  0xc5   : > { %v3549_v60 = vsel %vm328_vm0, %v266_v36, 0.0  ;;  %v812_v36 = vmul.f32 0.020408163, %v3332_v21  ;;  %v813_v21 = vmul.f32 0.020408163, %v3340_v27  ;;  %v1307_v27 = vrot.slane %v811_v7, %v3395_v0 }
  0xc6   : > { %555 = vadd.xlane.f32.xlu0 %v554_v48  ;;  %v280_v48 = vld [vmem:[%s3062_s28 + $0x380] sm:$0xff] }
  0xc7   : > { %606 = vadd.xlane.f32.xlu1 %v605_v49  ;;  %v3407_v11 = vpop.xlane.xlu0 %399  ;;  %v281_v49 = vld [vmem:[%s3062_s28 + $0x388] sm:$0xff]  ;;  %v1321_v17 = vrot.slane %v813_v21, %v3405_v10 }
  0xc8   : > { %v3409_v12 = vpop.xlane.xlu1 %351 }
  0xca   : > { %468 = vadd.xlane.f32.xlu0 %v467_v13  ;;  %v3493_v13 = vsel %vm328_vm0, %v280_v48, 0.0  ;;  %v826_v48 = vmul.f32 0.020408163, %v3314_v8  ;;  %v810_v8 = vmul.f32 0.020408163, %v3316_v9  ;;  %v1008_v9 = vld [vmem:[%s4539_s1 + $0x138] sm:$0xff] }
  0xcb   : > { %519 = vadd.xlane.f32.xlu1 %v518_v16  ;;  %v3459_v51 = vpop.xlane.xlu0 %402  ;;  %v3496_v16 = vsel %vm328_vm0, %v281_v49, 0.0  ;;  %v2770_v5 = vpack.c.bf16 %v1008_v9, %v1007_v58  ;;  %v815_v58 = vmul.f32 0.020408163, %v3365_v47  ;;  %v1027_v47 = vld [vmem:[%s4539_s1 + $0x1d0] sm:$0xff] }
  0xcc   : > { %v3461_v52 = vpop.xlane.xlu1 %354  ;;  %v1408_v31 = vrot.slane %v826_v48, %v3392_v63  ;;  %v814_v48 = vmul.f32 0.020408163, %v3348_v34  ;;  %v1314_v34 = vrot.slane %v812_v36, %v3398_v1 }
  0xcd   : > { %v1335_v21 = vrot.slane %v815_v58, %v3425_v24 }
  0xce   : > { %558 = vadd.xlane.f32.xlu0 %v557_v32  ;;  %v1409_v9 = vsel %vm1301_vm1, %v1408_v31, %v1404_v22  ;;  %v1428_v22 = vrot.slane %v830_v26, %v3422_v23  ;;  %v1012_v31 = vld [vmem:[%s4539_s1 + $0x158] sm:$0xff]  ;;  %v1328_v36 = vrot.slane %v814_v48, %v3422_v23  ;;  %v832_v26 = vmul.f32 0.020408163, %v3407_v11  ;;  %v1029_v11 = vld [vmem:[%s4539_s1 + $0x1e0] sm:$0xff] }
  0xcf   : > { %609 = vadd.xlane.f32.xlu1 %v608_v35  ;;  %v3515_v49 = vpop.xlane.xlu0 %405  ;;  %v3520_v35 = vsub.s32 %v1366_v55, %v3356_v40  ;;  %v3534_v55 = vsub.s32 %v1380_v4, %v3356_v40  ;;  %v2768_v4 = vpack.c.bf16 %v1024_v2, %v1023_v37  ;;  %v1026_v40 = vld [vmem:[%s4539_s1 + $0x1c8] sm:$0xff]  ;;  %v831_v37 = vmul.f32 0.020408163, %v3363_v46 }
  0xd0   : > { %v3517_v32 = vpop.xlane.xlu1 %357  ;;  %v1423_v46 = vrot.slane %v829_v3, %v3405_v10  ;;  %v1414_v7 = vsel %vm1308_vm2, %v1413_v38, %v1409_v9  ;;  %v816_v48 = vmul.f32 0.020408163, %v3409_v12  ;;  %v817_v12 = vmul.f32 0.020408163, %v3461_v52 }
  0xd1   : > { %2769 = vmatprep.subr.bf16.mxu1 %v2768_v4  ;;  %v1433_v3 = vrot.slane %v831_v37, %v3425_v24  ;;  %v1419_v38 = vsel %vm1315_vm3, %v1418_v33, %v1414_v7  ;;  %v833_v37 = vmul.f32 0.020408163, %v3459_v51  ;;  %v834_v51 = vmul.f32 0.020408163, %v3515_v49  ;;  %v1014_v33 = vld [vmem:[%s4539_s1 + $0x168] sm:$0xff] }
  0xd2   : > { %471 = vadd.xlane.f32.xlu0 %v3448_v43  ;;  %v1025_v43 = vld [vmem:[%s4539_s1 + $0x1c0] sm:$0xff]  ;;  %2771 = vmatpush3.bf16.msra.mxu1 %v2770_v5  ;;  %v1438_v49 = vrot.slane %v832_v26, %v3428_v25 }
  0xd3   : > { %561 = vadd.xlane.f32.xlu1 %v3451_v44  ;;  %v3564_v15 = vpop.xlane.xlu0 %408  ;;  %v1300_v44 = vrot.slane %v810_v8, %v3392_v63  ;;  %v2772_v2 = vpack.c.bf16 %v1026_v40, %v1025_v43  ;;  %v2774_v8 = vpack.c.bf16 %v1010_v41, %v1009_v39  ;;  %v2778_v40 = vpack.c.bf16 %v1012_v31, %v1011_v19 }
  0xd4   : > { %v3566_v20 = vpop.xlane.xlu1 %360  ;;  %v1424_v41 = vsel %vm1322_vm4, %v1423_v46, %v1419_v38  ;;  %v1443_v7 = vrot.slane %v833_v37, %v3431_v28 }
  0xd5   : > { %2773 = vmatprep.subr.bf16.mxu1 %v2772_v2 }
  0xd6   : > { %612 = vadd.xlane.f32.xlu0 %v3454_v45  ;;  %v1028_v45 = vld [vmem:[%s4539_s1 + $0x1d8] sm:$0xff]  ;;  %2775 = vmatpush3.bf16.msra.mxu1 %v2774_v8 }
  0xd7   : > { %564 = vadd.xlane.f32.xlu1 %v3467_v54  ;;  %v412_v4 = vpop.xlane.xlu0 %411  ;;  %v1302_v54 = vsel %vm1301_vm1, %v1300_v44, %v1295_v57  ;;  %v2776_v43 = vpack.c.bf16 %v1028_v45, %v1027_v47  ;;  %v1429_v57 = vsel %vm1329_vm5, %v1428_v22, %v1424_v41  ;;  %v818_v47 = vmul.f32 0.020408163, %v3517_v32  ;;  %v1031_v32 = vld [vmem:[%s4539_s1 + $0x1f0] sm:$0xff] }
  0xd8   : > { %v3595_v5 = vpop.xlane.xlu1 %363  ;;  %v1309_v44 = vsel %vm1308_vm2, %v1307_v27, %v1302_v54  ;;  %v1013_v27 = vld [vmem:[%s4539_s1 + $0x160] sm:$0xff]  ;;  %v1434_v9 = vsel %vm1336_vm6, %v1433_v3, %v1429_v57  ;;  %v835_v45 = vmul.f32 0.020408163, %v3564_v15  ;;  %v1342_v54 = vrot.slane %v816_v48, %v3428_v25 }
  0xd9   : > { %v1316_v39 = vsel %vm1315_vm3, %v1314_v34, %v1309_v44  ;;  %2777 = vmatprep.subr.bf16.mxu1 %v2776_v43  ;;  %v2782_v46 = vpack.c.bf16 %v1014_v33, %v1013_v27  ;;  %v836_v22 = vmul.f32 0.020408163, %v412_v4  ;;  %v1448_v15 = vrot.slane %v834_v51, %v3445_v42  ;;  %v1016_v4 = vld [vmem:[%s4539_s1 + $0x178] sm:$0xff] }
  0xda   : > { %615 = vadd.xlane.f32.xlu0 %v3479_v61  ;;  %v1030_v61 = vld [vmem:[%s4539_s1 + $0x1e8] sm:$0xff]  ;;  %2779 = vmatpush3.bf16.msra.mxu1 %v2778_v40  ;;  %v1453_v26 = vrot.slane %v835_v45, %v3464_v53 }
  0xdb   : > { %567 = vadd.xlane.f32.xlu1 %v3482_v62  ;;  %v415_v2 = vpop.xlane.xlu0 %414  ;;  %v1323_v62 = vsel %vm1322_vm4, %v1321_v17, %v1316_v39  ;;  %v2780_v34 = vpack.c.bf16 %v1030_v61, %v1029_v11  ;;  %v819_v17 = vmul.f32 0.020408163, %v3566_v20  ;;  %v1015_v20 = vld [vmem:[%s4539_s1 + $0x170] sm:$0xff]  ;;  %v312_v61 = vld [vmem:[%s3062_s28 + $0x480] sm:$0xff] }
  0xdc   : > { %v367_v8 = vpop.xlane.xlu1 %366  ;;  %v1330_v58 = vsel %vm1329_vm5, %v1328_v36, %v1323_v62  ;;  %v820_v36 = vmul.f32 0.020408163, %v3595_v5  ;;  %v837_v3 = vmul.f32 0.020408163, %v415_v2  ;;  %v2786_v38 = vpack.c.bf16 %v1016_v4, %v1015_v20 }
  0xdd   : > { %v1337_v52 = vsel %vm1336_vm6, %v1335_v21, %v1330_v58  ;;  %2781 = vmatprep.subr.bf16.mxu1 %v2780_v34  ;;  %v821_v43 = vmul.f32 0.020408163, %v367_v8  ;;  %v1439_v21 = vsel %vm1343_vm7, %v1438_v49, %v1434_v9  ;;  %v1356_v5 = vrot.slane %v818_v47, %v3445_v42 }
  0xde   : > { %666 = vadd.xlane.f32.xlu0 %v3493_v13  ;;  %v1032_v13 = vld [vmem:[%s4539_s1 + $0x1f8] sm:$0xff]  ;;  %2783 = vmatpush3.bf16.msra.mxu1 %v2782_v46  ;;  %v1344_v41 = vsel %vm1343_vm7, %v1342_v54, %v1337_v52  ;;  %v1444_v48 = vsel %vm1350_vm8, %v1443_v7, %v1439_v21  ;;  %v1363_v37 = vrot.slane %v819_v17, %v3464_v53  ;;  %v761_v46 = vsel %vm328_vm0, %v312_v61, 0.0  ;;  %v313_v17 = vld [vmem:[%s3062_s28 + $0x488] sm:$0xff]  ;;  %v1035_v61 = vld [vmem:[%s4539_s1 + $0x210] sm:$0xff] }
  0xdf   : > { %669 = vadd.xlane.f32.xlu1 %v3496_v16  ;;  %v418_v19 = vpop.xlane.xlu0 %417  ;;  %v1349_v16 = vrot.slane %v817_v12, %v3431_v28  ;;  %v2784_v44 = vpack.c.bf16 %v1032_v13, %v1031_v32  ;;  %v1458_v2 = vrot.slane %v836_v22, %v3520_v35  ;;  %v1370_v62 = vrot.slane %v820_v36, %v3520_v35  ;;  %v267_v22 = vld [vmem:[%s3062_s28 + $0x318] sm:$0xff]  ;;  %v1033_v32 = vld [vmem:[%s4539_s1 + $0x200] sm:$0xff]  ;;  %v1034_v13 = vld [vmem:[%s4539_s1 + $0x208] sm:$0xff] }
  0xe0   : > { %v370_v31 = vpop.xlane.xlu1 %369  ;;  %v838_v40 = vmul.f32 0.020408163, %v418_v19  ;;  %v1463_v57 = vrot.slane %v837_v3, %v3523_v50  ;;  %v1449_v51 = vsel %vm1357_vm9, %v1448_v15, %v1444_v48  ;;  %v1377_v27 = vrot.slane %v821_v43, %v3523_v50  ;;  %v1051_v43 = vld [vmem:[%s4539_s1 + $0x290] sm:$0xff] }
  0xe1   : > { %v822_v39 = vmul.f32 0.020408163, %v370_v31  ;;  %2785 = vmatprep.subr.bf16.mxu1 %v2784_v44  ;;  %v1454_v9 = vsel %vm1364_vm10, %v1453_v26, %v1449_v51  ;;  %v764_v20 = vsel %vm328_vm0, %v313_v17, 0.0  ;;  %v2790_v26 = vpack.c.bf16 %v1034_v13, %v1033_v32 }
  0xe2   : > { %618 = vadd.xlane.f32.xlu0 %v3505_v29  ;;  %2787 = vmatpush3.bf16.msra.mxu1 %v2786_v38  ;;  %v1468_v33 = vrot.slane %v838_v40, %v3534_v55  ;;  %v1459_v49 = vsel %vm1371_vm11, %v1458_v2, %v1454_v9  ;;  %v1052_v40 = vld [vmem:[%s4539_s1 + $0x298] sm:$0xff]  ;;  %v284_v2 = vld [vmem:[%s3062_s28 + $0x3a0] sm:$0xff] }
  0xe3   : > { %621 = vadd.xlane.f32.xlu1 %v3508_v30  ;;  %v421_v8 = vpop.xlane.xlu0 %420  ;;  %v1351_v30 = vsel %vm1350_vm8, %v1349_v16, %v1344_v41  ;;  %v1384_v34 = vrot.slane %v822_v39, %v3534_v55 }
  0xe4   : > { %v373_v11 = vpop.xlane.xlu1 %372  ;;  %v839_v12 = vmul.f32 0.020408163, %v421_v8  ;;  %v1358_v58 = vsel %vm1357_vm9, %v1356_v5, %v1351_v30  ;;  %v296_v8 = vld [vmem:[%s3062_s28 + $0x400] sm:$0xff]  ;;  %v1054_v30 = vld [vmem:[%s4539_s1 + $0x2a8] sm:$0xff] }
  0xe5   : > { %v823_v29 = vmul.f32 0.020408163, %v373_v11  ;;  %v1365_v52 = vsel %vm1364_vm10, %v1363_v37, %v1358_v58  ;;  %v2792_v11 = vpack.c.bf16 %v1052_v40, %v1051_v43  ;;  %v713_v58 = vsel %vm328_vm0, %v296_v8, 0.0  ;;  %v1039_v40 = vld [vmem:[%s4539_s1 + $0x230] sm:$0xff] }
  0xe6   : > { %672 = vadd.xlane.f32.xlu0 %v3546_v14  ;;  %v1473_v47 = vrot.slane %v839_v12, %v3537_v56  ;;  %v1372_v19 = vsel %vm1371_vm11, %v1370_v62, %v1365_v52  ;;  %v1036_v62 = vld [vmem:[%s4539_s1 + $0x218] sm:$0xff]  ;;  %v297_v52 = vld [vmem:[%s3062_s28 + $0x408] sm:$0xff] }
  0xe7   : > { %624 = vadd.xlane.f32.xlu1 %v3549_v60  ;;  %v1391_v45 = vrot.slane %v823_v29, %v3537_v56  ;;  %v424_v54 = vpop.xlane.xlu0 %423  ;;  %v1464_v60 = vsel %vm1378_vm12, %v1463_v57, %v1459_v49  ;;  %v1379_v16 = vsel %vm1378_vm12, %v1377_v27, %v1372_v19  ;;  %v1053_v29 = vld [vmem:[%s4539_s1 + $0x2a0] sm:$0xff]  ;;  %v314_v49 = vld [vmem:[%s3062_s28 + $0x490] sm:$0xff]  ;;  %v716_v32 = vsel %vm328_vm0, %v297_v52, 0.0 }
  0xe8   : > { %v376_v7 = vpop.xlane.xlu1 %375  ;;  %v840_v31 = vmul.f32 0.020408163, %v424_v54  ;;  %v1469_v15 = vsel %vm1385_vm13, %v1468_v33, %v1464_v60  ;;  %v1386_v4 = vsel %vm1385_vm13, %v1384_v34, %v1379_v16  ;;  %v677_v33 = vsel %vm328_vm0, %v284_v2, 0.0  ;;  %v1037_v54 = vld [vmem:[%s4539_s1 + $0x220] sm:$0xff]  ;;  %v1055_v19 = vld [vmem:[%s4539_s1 + $0x2b0] sm:$0xff] }
  0xe9   : > { %v824_v14 = vmul.f32 0.020408163, %v376_v7  ;;  %v1474_v21 = vsel %vm1392_vm14, %v1473_v47, %v1469_v15  ;;  %v1393_v5 = vsel %vm1392_vm14, %v1391_v45, %v1386_v4  ;;  %v2794_v47 = vpack.c.bf16 %v1036_v62, %v1035_v61  ;;  %v1038_v7 = vld [vmem:[%s4539_s1 + $0x228] sm:$0xff]  ;;  %v315_v61 = vld [vmem:[%s3062_s28 + $0x498] sm:$0xff] }
  0xea   : > { %v1478_v36 = vrot.slane %v840_v31, %v3557_v18  ;;  %675 = vadd.xlane.f32.xlu0 %v3598_v6  ;;  %v626_v6 = vsel %vm328_vm0, %v267_v22, 0.0  ;;  %v2796_v45 = vpack.c.bf16 %v1054_v30, %v1053_v29  ;;  %v1056_v31 = vld [vmem:[%s4539_s1 + $0x2b8] sm:$0xff]  ;;  %v767_v13 = vsel %vm328_vm0, %v314_v49, 0.0  ;;  %v1042_v29 = vld [vmem:[%s4539_s1 + $0x248] sm:$0xff] }
  0xeb   : > { %v1398_v3 = vrot.slane %v824_v14, %v3557_v18  ;;  %762 = vadd.xlane.f32.xlu1 %v761_v46  ;;  %v475_v44 = vpop.xlane.xlu0 %474  ;;  %v2798_v4 = vpack.c.bf16 %v1038_v7, %v1037_v54  ;;  %v2800_v43 = vpack.c.bf16 %v1056_v31, %v1055_v19  ;;  %v286_v54 = vld [vmem:[%s3062_s28 + $0x3b0] sm:$0xff]  ;;  %v1044_v19 = vld [vmem:[%s4539_s1 + $0x258] sm:$0xff] }
  0xec   : > { %v478_v38 = vpop.xlane.xlu1 %477  ;;  %v857_v39 = vmul.f32 0.020408163, %v475_v44  ;;  %v1479_v48 = vsel %vm1399_vm15, %v1478_v36, %v1474_v21  ;;  %v1040_v44 = vld [vmem:[%s4539_s1 + $0x238] sm:$0xff] }
  0xed   : > { %v858_v41 = vmul.f32 0.020408163, %v478_v38  ;;  %v1400_v37 = vsel %vm1399_vm15, %v1398_v3, %v1393_v5  ;;  %2186 = vmatprep.mubr.f32.mxu0 %v1479_v48  ;;  %v268_v3 = vld [vmem:[%s3062_s28 + $0x320] sm:$0xff]  ;;  %v1058_v5 = vld [vmem:[%s4539_s1 + $0x2c8] sm:$0xff]  ;;  %v2802_v62 = vpack.c.bf16 %v1040_v44, %v1039_v40  ;;  %v299_v40 = vld [vmem:[%s3062_s28 + $0x418] sm:$0xff] }
  0xee   : > { %v1562_v57 = vrot.slane %v857_v39, %v3388_v59  ;;  %765 = vadd.xlane.f32.xlu0 %v764_v20  ;;  %2187 = vmatmul.mubr.f32.vlgmr.msra.gmra.mrb[0].mxu0 %v1400_v37  ;;  %v285_v20 = vld [vmem:[%s3062_s28 + $0x3a8] sm:$0xff]  ;;  %v316_v44 = vld [vmem:[%s3062_s28 + $0x4a0] sm:$0xff] }
  0xef   : > { %v1566_v12 = vrot.slane %v858_v41, %v3392_v63  ;;  %627 = vadd.xlane.f32.xlu1 %v626_v6  ;;  %v427_v51 = vpop.xlane.xlu0 %426  ;;  %2791 = vmatpush3.bf16.msra.mxu0 %v2790_v26  ;;  %v1057_v6 = vld [vmem:[%s4539_s1 + $0x2c0] sm:$0xff]  ;;  %v629_v41 = vsel %vm328_vm0, %v268_v3, 0.0  ;;  %v680_v48 = vsel %vm328_vm0, %v285_v20, 0.0  ;;  %v683_v3 = vsel %vm328_vm0, %v286_v54, 0.0 }
  0xf0   : > { %v430_v27 = vpop.xlane.xlu1 %429  ;;  %v841_v34 = vmul.f32 0.020408163, %v427_v51  ;;  %2793 = vmatprep.subr.bf16.mxu0 %v2792_v11  ;;  %v298_v11 = vld [vmem:[%s3062_s28 + $0x410] sm:$0xff] }
  0xf1   : > { %v1567_v9 = vsel %vm1301_vm1, %v1566_v12, %v1562_v57  ;;  %v842_v46 = vmul.f32 0.020408163, %v430_v27  ;;  %v2804_v57 = vpack.c.bf16 %v1058_v5, %v1057_v6  ;;  %v1041_v12 = vld [vmem:[%s4539_s1 + $0x240] sm:$0xff]  ;;  %v1059_v27 = vld [vmem:[%s4539_s1 + $0x2d0] sm:$0xff]  ;;  %v1046_v5 = vld [vmem:[%s4539_s1 + $0x268] sm:$0xff] }
  0xf2   : > { %v1483_v17 = vrot.slane %v841_v34, %v3388_v59  ;;  %678 = vadd.xlane.f32.xlu0 %v677_v33  ;;  %v1060_v33 = vld [vmem:[%s4539_s1 + $0x2d8] sm:$0xff]  ;;  %v719_v34 = vsel %vm328_vm0, %v298_v11, 0.0  ;;  %v2806_v7 = vpack.c.bf16 %v1042_v29, %v1041_v12  ;;  %v1045_v6 = vld [vmem:[%s4539_s1 + $0x260] sm:$0xff]  ;;  %v773_v11 = vsel %vm328_vm0, %v316_v44, 0.0 }
  0xf3   : > { %v1487_v22 = vrot.slane %v842_v46, %v3392_v63  ;;  %714 = vadd.xlane.f32.xlu1 %v713_v58  ;;  %v481_v14 = vpop.xlane.xlu0 %480  ;;  %2795 = vmatpush3.bf16.msra.mxu0 %v2794_v47  ;;  %v770_v46 = vsel %vm328_vm0, %v315_v61, 0.0  ;;  %v270_v61 = vld [vmem:[%s3062_s28 + $0x330] sm:$0xff]  ;;  %v288_v44 = vld [vmem:[%s3062_s28 + $0x3c0] sm:$0xff] }
  0xf4   : > { %v433_v60 = vpop.xlane.xlu1 %432  ;;  %v859_v15 = vmul.f32 0.020408163, %v481_v14  ;;  %2797 = vmatprep.subr.bf16.mxu0 %v2796_v45  ;;  %v269_v45 = vld [vmem:[%s3062_s28 + $0x328] sm:$0xff] }
  0xf5   : > { %v1488_v16 = vsel %vm1301_vm1, %v1487_v22, %v1483_v17  ;;  %v843_v36 = vmul.f32 0.020408163, %v433_v60  ;;  %v2808_v17 = vpack.c.bf16 %v1060_v33, %v1059_v27  ;;  %v1043_v22 = vld [vmem:[%s4539_s1 + $0x250] sm:$0xff]  ;;  %v1048_v27 = vld [vmem:[%s4539_s1 + $0x278] sm:$0xff] }
  0xf6   : > { %v1571_v38 = vrot.slane %v859_v15, %v3395_v0  ;;  %717 = vadd.xlane.f32.xlu0 %v716_v32  ;;  %v1061_v32 = vld [vmem:[%s4539_s1 + $0x2e0] sm:$0xff] }
  0xf7   : > { %v1492_v21 = vrot.slane %v843_v36, %v3395_v0  ;;  %768 = vadd.xlane.f32.xlu1 %v767_v13  ;;  %v484_v26 = vpop.xlane.xlu0 %483  ;;  %2799 = vmatpush3.bf16.msra.mxu0 %v2798_v4  ;;  %v1062_v13 = vld [vmem:[%s4539_s1 + $0x2e8] sm:$0xff]  ;;  %v632_v36 = vsel %vm328_vm0, %v269_v45, 0.0 }
  0xf8   : > { %v571_v39 = vpop.xlane.xlu1 %570  ;;  %v1572_v37 = vsel %vm1308_vm2, %v1571_v38, %v1567_v9  ;;  %v860_v8 = vmul.f32 0.020408163, %v484_v26  ;;  %2801 = vmatprep.subr.bf16.mxu0 %v2800_v43  ;;  %v2810_v38 = vpack.c.bf16 %v1044_v19, %v1043_v22  ;;  %v300_v19 = vld [vmem:[%s3062_s28 + $0x420] sm:$0xff] }
  0xf9   : > { %v1493_v2 = vsel %vm1308_vm2, %v1492_v21, %v1488_v16  ;;  %v889_v51 = vmul.f32 0.020408163, %v571_v39  ;;  %v2812_v21 = vpack.c.bf16 %v1062_v13, %v1061_v32 }
  0xfa   : > { %v1576_v30 = vrot.slane %v860_v8, %v3398_v1  ;;  %630 = vadd.xlane.f32.xlu0 %v629_v41  ;;  %v1063_v41 = vld [vmem:[%s4539_s1 + $0x2f0] sm:$0xff]  ;;  %v722_v8 = vsel %vm328_vm0, %v299_v40, 0.0  ;;  %v271_v40 = vld [vmem:[%s3062_s28 + $0x338] sm:$0xff] }
  0xfb   : > { %681 = vadd.xlane.f32.xlu1 %v680_v48  ;;  %v574_v58 = vpop.xlane.xlu0 %573  ;;  %2803 = vmatpush3.bf16.msra.mxu0 %v2802_v62  ;;  %v1720_v31 = vrot.slane %v889_v51, %v3388_v59  ;;  %v1064_v48 = vld [vmem:[%s4539_s1 + $0x2f8] sm:$0xff]  ;;  %v1047_v51 = vld [vmem:[%s4539_s1 + $0x270] sm:$0xff] }
  0xfc   : > { %v436_v9 = vpop.xlane.xlu1 %435  ;;  %v1577_v52 = vsel %vm1315_vm3, %v1576_v30, %v1572_v37  ;;  %v890_v49 = vmul.f32 0.020408163, %v574_v58  ;;  %2805 = vmatprep.subr.bf16.mxu0 %v2804_v57  ;;  %v287_v62 = vld [vmem:[%s3062_s28 + $0x3b8] sm:$0xff]  ;;  %v2814_v30 = vpack.c.bf16 %v1046_v5, %v1045_v6  ;;  %v2816_v33 = vpack.c.bf16 %v1064_v48, %v1063_v41 }
  0xfd   : > { %v844_v47 = vmul.f32 0.020408163, %v436_v9  ;;  %v2818_v45 = vpack.c.bf16 %v1048_v27, %v1047_v51  ;;  %v272_v51 = vld [vmem:[%s3062_s28 + $0x340] sm:$0xff]  ;;  %v289_v27 = vld [vmem:[%s3062_s28 + $0x3c8] sm:$0xff] }
  0xfe   : > { %v1724_v14 = vrot.slane %v890_v49, %v3392_v63  ;;  %720 = vadd.xlane.f32.xlu0 %v719_v34  ;;  %v635_v49 = vsel %vm328_vm0, %v270_v61, 0.0 }
  0xff   : > { %v1497_v60 = vrot.slane %v844_v47, %v3398_v1  ;;  %771 = vadd.xlane.f32.xlu1 %v770_v46  ;;  %v487_v16 = vpop.xlane.xlu0 %486  ;;  %2807 = vmatpush3.bf16.msra.mxu0 %v2806_v7  ;;  %v686_v47 = vsel %vm328_vm0, %v287_v62, 0.0 }
 0x100   : > { %v523_v15 = vpop.xlane.xlu1 %522  ;;  %v1725_v20 = vsel %vm1301_vm1, %v1724_v14, %v1720_v31  ;;  %v861_v43 = vmul.f32 0.020408163, %v487_v16  ;;  %2809 = vmatprep.subr.bf16.mxu0 %v2808_v17  ;;  %v317_v31 = vld [vmem:[%s3062_s28 + $0x4a8] sm:$0xff]  ;;  %v725_v16 = vsel %vm328_vm0, %v300_v19, 0.0 }
 0x101   : > { %v1498_v4 = vsel %vm1315_vm3, %v1497_v60, %v1493_v2  ;;  %v873_v39 = vmul.f32 0.020408163, %v523_v15  ;;  %v776_v15 = vsel %vm328_vm0, %v317_v31, 0.0 }
 0x102   : > { %v1581_v26 = vrot.slane %v861_v43, %v3405_v10  ;;  %633 = vadd.xlane.f32.xlu0 %v632_v36 }
 0x103   : > { %684 = vadd.xlane.f32.xlu1 %v683_v3  ;;  %v526_v37 = vpop.xlane.xlu0 %525  ;;  %2811 = vmatpush3.bf16.msra.mxu0 %v2810_v38  ;;  %v1641_v58 = vrot.slane %v873_v39, %v3388_v59 }
 0x104   : > { %v577_v2 = vpop.xlane.xlu1 %576  ;;  %v1582_v57 = vsel %vm1322_vm4, %v1581_v26, %v1577_v52  ;;  %v874_v12 = vmul.f32 0.020408163, %v526_v37  ;;  %2813 = vmatprep.subr.bf16.mxu0 %v2812_v21  ;;  %v689_v26 = vsel %vm328_vm0, %v288_v44, 0.0  ;;  %v301_v37 = vld [vmem:[%s3062_s28 + $0x428] sm:$0xff] }
 0x105   : > { %v891_v29 = vmul.f32 0.020408163, %v577_v2  ;;  %v318_v2 = vld [vmem:[%s3062_s28 + $0x4b0] sm:$0xff]  ;;  %v728_v62 = vsel %vm328_vm0, %v301_v37, 0.0 }
 0x106   : > { %v1645_v9 = vrot.slane %v874_v12, %v3392_v63  ;;  %723 = vadd.xlane.f32.xlu0 %v722_v8 }
 0x107   : > { %v1729_v34 = vrot.slane %v891_v29, %v3395_v0  ;;  %774 = vadd.xlane.f32.xlu1 %v773_v11  ;;  %v439_v46 = vpop.xlane.xlu0 %438  ;;  %2815 = vmatpush3.bf16.msra.mxu0 %v2814_v30 }
 0x108   : > { %v490_v52 = vpop.xlane.xlu1 %489  ;;  %v1646_v54 = vsel %vm1301_vm1, %v1645_v9, %v1641_v58  ;;  %v845_v17 = vmul.f32 0.020408163, %v439_v46  ;;  %2817 = vmatprep.subr.bf16.mxu0 %v2816_v33  ;;  %v641_v46 = vsel %vm328_vm0, %v272_v51, 0.0 }
 0x109   : > { %v1730_v7 = vsel %vm1308_vm2, %v1729_v34, %v1725_v20  ;;  %v862_v22 = vmul.f32 0.020408163, %v490_v52  ;;  %v692_v52 = vsel %vm328_vm0, %v289_v27, 0.0  ;;  %v275_v27 = vld [vmem:[%s3062_s28 + $0x358] sm:$0xff] }
 0x10a   : > { %v1502_v14 = vrot.slane %v845_v17, %v3405_v10  ;;  %636 = vadd.xlane.f32.xlu0 %v635_v49 }
 0x10b   : > { %v1586_v60 = vrot.slane %v862_v22, %v3422_v23  ;;  %687 = vadd.xlane.f32.xlu1 %v686_v47  ;;  %v529_v32 = vpop.xlane.xlu0 %528  ;;  %2819 = vmatpush3.bf16.msra.mxu0 %v2818_v45  ;;  %v302_v45 = vld [vmem:[%s3062_s28 + $0x430] sm:$0xff] }
 0x10c   : > { %v580_v13 = vpop.xlane.xlu1 %579  ;;  %v1503_v36 = vsel %vm1322_vm4, %v1502_v14, %v1498_v4  ;;  %v875_v20 = vmul.f32 0.020408163, %v529_v32  ;;  %v638_v4 = vsel %vm328_vm0, %v271_v40, 0.0  ;;  %v731_v22 = vsel %vm328_vm0, %v302_v45, 0.0  ;;  %v290_v32 = vld [vmem:[%s3062_s28 + $0x3d0] sm:$0xff] }
 0x10d   : > { %v3862_v3 = vsel %vm1329_vm5, %v1586_v60, %v1582_v57  ;;  %v892_v43 = vmul.f32 0.020408163, %v580_v13  ;;  %v779_v57 = vsel %vm328_vm0, %v318_v2, 0.0  ;;  %v273_v60 = vld [vmem:[%s3062_s28 + $0x348] sm:$0xff]  ;;  %v322_v45 = vld [vmem:[%s3062_s28 + $0x4d0] sm:$0xff] }
 0x10e   : > { %v1650_v38 = vrot.slane %v875_v20, %v3395_v0  ;;  %726 = vadd.xlane.f32.xlu0 %v725_v16  ;;  %v644_v20 = vsel %vm328_vm0, %v273_v60, 0.0 }
 0x10f   : > { %v1734_v21 = vrot.slane %v892_v43, %v3398_v1  ;;  %777 = vadd.xlane.f32.xlu1 %v776_v15  ;;  %v442_v6 = vpop.xlane.xlu0 %441  ;;  %v695_v43 = vsel %vm328_vm0, %v290_v32, 0.0 }
 0x110   : > { %v3868_v5 = vpop.xlane.xlu1 %492  ;;  %v1651_v39 = vsel %vm1308_vm2, %v1650_v38, %v1646_v54  ;;  %v846_v48 = vmul.f32 0.020408163, %v442_v6  ;;  %v319_v54 = vld [vmem:[%s3062_s28 + $0x4b8] sm:$0xff] }
 0x111   : > { %v1735_v41 = vsel %vm1315_vm3, %v1734_v21, %v1730_v7  ;;  %v782_v19 = vsel %vm328_vm0, %v319_v54, 0.0  ;;  %v303_v38 = vld [vmem:[%s3062_s28 + $0x438] sm:$0xff]  ;;  %v320_v21 = vld [vmem:[%s3062_s28 + $0x4c0] sm:$0xff] }
 0x112   : > { %v1507_v8 = vrot.slane %v846_v48, %v3422_v23  ;;  %639 = vadd.xlane.f32.xlu0 %v638_v4  ;;  %v291_v48 = vld [vmem:[%s3062_s28 + $0x3d8] sm:$0xff] }
 0x113   : > { %690 = vadd.xlane.f32.xlu1 %v689_v26  ;;  %v532_v11 = vpop.xlane.xlu0 %531  ;;  %v734_v26 = vsel %vm328_vm0, %v303_v38, 0.0 }
 0x114   : > { %v583_v61 = vpop.xlane.xlu1 %582  ;;  %v3880_v12 = vsel %vm1329_vm5, %v1507_v8, %v1503_v36  ;;  %v876_v29 = vmul.f32 0.020408163, %v532_v11  ;;  %v698_v11 = vsel %vm328_vm0, %v291_v48, 0.0 }
 0x115   : > { %v893_v30 = vmul.f32 0.020408163, %v583_v61  ;;  %v304_v61 = vld [vmem:[%s3062_s28 + $0x440] sm:$0xff] }
 0x116   : > { %v1655_v33 = vrot.slane %v876_v29, %v3398_v1  ;;  %729 = vadd.xlane.f32.xlu0 %v728_v62  ;;  %v321_v62 = vld [vmem:[%s3062_s28 + $0x4c8] sm:$0xff] }
 0x117   : > { %v1739_v58 = vrot.slane %v893_v30, %v3405_v10  ;;  %780 = vadd.xlane.f32.xlu1 %v779_v57  ;;  %v3886_v9 = vpop.xlane.xlu0 %444  ;;  %v737_v30 = vsel %vm328_vm0, %v304_v61, 0.0  ;;  %v788_v51 = vsel %vm328_vm0, %v321_v62, 0.0  ;;  %v307_v62 = vld [vmem:[%s3062_s28 + $0x458] sm:$0xff] }
 0x118   : > { %v3888_v34 = vpop.xlane.xlu1 %495  ;;  %v1656_v49 = vsel %vm1315_vm3, %v1655_v33, %v1651_v39  ;;  %v785_v39 = vsel %vm328_vm0, %v320_v21, 0.0  ;;  %v292_v33 = vld [vmem:[%s3062_s28 + $0x3e0] sm:$0xff] }
 0x119   : > { %v1740_v47 = vsel %vm1322_vm4, %v1739_v58, %v1735_v41  ;;  %v274_v41 = vld [vmem:[%s3062_s28 + $0x350] sm:$0xff] }
 0x11a   : > { %642 = vadd.xlane.f32.xlu0 %v641_v46  ;;  %v647_v8 = vsel %vm328_vm0, %v274_v41, 0.0  ;;  %v294_v41 = vld [vmem:[%s3062_s28 + $0x3f0] sm:$0xff] }
 0x11b   : > { %693 = vadd.xlane.f32.xlu1 %v692_v52  ;;  %v535_v7 = vpop.xlane.xlu0 %534  ;;  %v650_v52 = vsel %vm328_vm0, %v275_v27, 0.0  ;;  %v707_v61 = vsel %vm328_vm0, %v294_v41, 0.0  ;;  %v279_v41 = vld [vmem:[%s3062_s28 + $0x378] sm:$0xff] }
 0x11c   : > { %v586_v17 = vpop.xlane.xlu1 %585  ;;  %v877_v31 = vmul.f32 0.020408163, %v535_v7 }
 0x11d   : > { %v894_v14 = vmul.f32 0.020408163, %v586_v17 }
 0x11e   : > { %v1660_v13 = vrot.slane %v877_v31, %v3405_v10  ;;  %732 = vadd.xlane.f32.xlu0 %v731_v22  ;;  %v791_v22 = vsel %vm328_vm0, %v322_v45, 0.0  ;;  %v293_v31 = vld [vmem:[%s3062_s28 + $0x3e8] sm:$0xff]  ;;  %v278_v45 = vld [vmem:[%s3062_s28 + $0x370] sm:$0xff] }
 0x11f   : > { %v1744_v16 = vrot.slane %v894_v14, %v3422_v23  ;;  %783 = vadd.xlane.f32.xlu1 %v782_v19  ;;  %v3902_v15 = vpop.xlane.xlu0 %447  ;;  %v276_v19 = vld [vmem:[%s3062_s28 + $0x360] sm:$0xff] }
 0x120   : > { %v3904_v36 = vpop.xlane.xlu1 %498  ;;  %v3909_v40 = vsel %vm1322_vm4, %v1660_v13, %v1656_v49  ;;  %v701_v49 = vsel %vm328_vm0, %v292_v33, 0.0  ;;  %v653_v32 = vsel %vm328_vm0, %v276_v19, 0.0  ;;  %v704_v13 = vsel %vm328_vm0, %v293_v31, 0.0 }
 0x121   : > { %v3912_v44 = vsel %vm1329_vm5, %v1744_v16, %v1740_v47  ;;  %v305_v47 = vld [vmem:[%s3062_s28 + $0x448] sm:$0xff]  ;;  %v306_v16 = vld [vmem:[%s3062_s28 + $0x450] sm:$0xff]  ;;  %v746_v33 = vsel %vm328_vm0, %v307_v62, 0.0  ;;  %v863_v19 = vmul.f32 0.020408163, %v3868_v5 }
 0x122   : > { %645 = vadd.xlane.f32.xlu0 %v644_v20  ;;  %v740_v17 = vsel %vm328_vm0, %v305_v47, 0.0  ;;  %v323_v20 = vld [vmem:[%s3062_s28 + $0x4d8] sm:$0xff]  ;;  %v743_v21 = vsel %vm328_vm0, %v306_v16, 0.0  ;;  %v1082_v47 = vld [vmem:[%s4539_s1 + $0x388] sm:$0xff]  ;;  %v848_v5 = vmul.f32 0.020408163, %v3902_v15 }
 0x123   : > { %696 = vadd.xlane.f32.xlu1 %v695_v43  ;;  %v3916_v6 = vpop.xlane.xlu0 %537  ;;  %v865_v62 = vmul.f32 0.020408163, %v3904_v36  ;;  %v662_v15 = vsel %vm328_vm0, %v279_v41, 0.0  ;;  %v310_v36 = vld [vmem:[%s3062_s28 + $0x470] sm:$0xff]  ;;  %v1113_v41 = vld [vmem:[%s4539_s1 + $0x480] sm:$0xff] }
 0x124   : > { %v3918_v4 = vpop.xlane.xlu1 %588 }
 0x126   : > { %735 = vadd.xlane.f32.xlu0 %v734_v26  ;;  %v794_v26 = vsel %vm328_vm0, %v323_v20, 0.0  ;;  %v308_v20 = vld [vmem:[%s3062_s28 + $0x460] sm:$0xff] }
 0x127   : > { %786 = vadd.xlane.f32.xlu1 %v785_v39  ;;  %v3924_v37 = vpop.xlane.xlu0 %450  ;;  %v277_v39 = vld [vmem:[%s3062_s28 + $0x368] sm:$0xff] }
 0x128   : > { %v3926_v2 = vpop.xlane.xlu1 %501 }
 0x12a   : > { %648 = vadd.xlane.f32.xlu0 %v647_v8 }
 0x12b   : > { %699 = vadd.xlane.f32.xlu1 %v698_v11  ;;  %v3932_v57 = vpop.xlane.xlu0 %540  ;;  %v656_v11 = vsel %vm328_vm0, %v277_v39, 0.0  ;;  %v864_v39 = vmul.f32 0.020408163, %v3888_v34  ;;  %v878_v34 = vmul.f32 0.020408163, %v3916_v6  ;;  %v1517_v6 = vrot.slane %v848_v5, %v3428_v25 }
 0x12c   : > { %v3934_v29 = vpop.xlane.xlu1 %591 }
 0x12e   : > { %738 = vadd.xlane.f32.xlu0 %v737_v30  ;;  %v324_v30 = vld [vmem:[%s3062_s28 + $0x4e0] sm:$0xff] }
 0x12f   : > { %789 = vadd.xlane.f32.xlu1 %v788_v51  ;;  %v3940_v58 = vpop.xlane.xlu0 %453 }
 0x130   : > { %v3942_v46 = vpop.xlane.xlu1 %504 }
 0x132   : > { %651 = vadd.xlane.f32.xlu0 %v650_v52  ;;  %v797_v52 = vsel %vm328_vm0, %v324_v30, 0.0  ;;  %v749_v30 = vsel %vm328_vm0, %v308_v20, 0.0  ;;  %v849_v20 = vmul.f32 0.020408163, %v3924_v37 }
 0x133   : > { %702 = vadd.xlane.f32.xlu1 %v701_v49  ;;  %v3948_v54 = vpop.xlane.xlu0 %543  ;;  %v1081_v49 = vld [vmem:[%s4539_s1 + $0x380] sm:$0xff] }
 0x134   : > { %v3950_v7 = vpop.xlane.xlu1 %594 }
 0x136   : > { %741 = vadd.xlane.f32.xlu0 %v740_v17  ;;  %v295_v17 = vld [vmem:[%s3062_s28 + $0x3f8] sm:$0xff] }
 0x137   : > { %792 = vadd.xlane.f32.xlu1 %v791_v22  ;;  %v3956_v14 = vpop.xlane.xlu0 %456  ;;  %v2820_v22 = vpack.c.bf16 %v1082_v47, %v1081_v49  ;;  %v710_v16 = vsel %vm328_vm0, %v295_v17, 0.0 }
 0x138   : > { %v3958_v60 = vpop.xlane.xlu1 %507 }
 0x139   : > { %2821 = vmatprep.subr.bf16.mxu1 %v2820_v22  ;;  %v1596_v22 = vrot.slane %v864_v39, %v3428_v25  ;;  %v1601_v39 = vrot.slane %v865_v62, %v3431_v28 }
 0x13a   : > { %654 = vadd.xlane.f32.xlu0 %v653_v32 }
 0x13b   : > { %705 = vadd.xlane.f32.xlu1 %v704_v13  ;;  %v3964_v43 = vpop.xlane.xlu0 %546  ;;  %v659_v13 = vsel %vm328_vm0, %v278_v45, 0.0  ;;  %v327_v45 = vld [vmem:[%s3062_s28 + $0x4f8] sm:$0xff] }
 0x13c   : > { %v3966_v38 = vpop.xlane.xlu1 %597 }
 0x13e   : > { %744 = vadd.xlane.f32.xlu0 %v743_v21  ;;  %v325_v21 = vld [vmem:[%s3062_s28 + $0x4e8] sm:$0xff] }
 0x13f   : > { %795 = vadd.xlane.f32.xlu1 %v794_v26  ;;  %v3972_v48 = vpop.xlane.xlu0 %459  ;;  %v847_v26 = vmul.f32 0.020408163, %v3886_v9  ;;  %v1591_v9 = vrot.slane %v863_v19, %v3425_v24 }
 0x140   : > { %v3974_v8 = vpop.xlane.xlu1 %510 }
 0x141   : > { %v1512_v17 = vrot.slane %v847_v26, %v3425_v24  ;;  %v1114_v26 = vld [vmem:[%s4539_s1 + $0x488] sm:$0xff]  ;;  %v1592_v37 = vsel %vm1336_vm6, %v1591_v9, %v3862_v3  ;;  %v1522_v9 = vrot.slane %v849_v20, %v3431_v28 }
 0x142   : > { %657 = vadd.xlane.f32.xlu0 %v656_v11  ;;  %v309_v11 = vld [vmem:[%s3062_s28 + $0x468] sm:$0xff]  ;;  %v2852_v5 = vpack.c.bf16 %v1114_v26, %v1113_v41 }
 0x143   : > { %708 = vadd.xlane.f32.xlu1 %v707_v61  ;;  %v3980_v51 = vpop.xlane.xlu0 %549  ;;  %v326_v61 = vld [vmem:[%s3062_s28 + $0x4f0] sm:$0xff]  ;;  %v752_v47 = vsel %vm328_vm0, %v309_v11, 0.0  ;;  %v806_v11 = vsel %vm328_vm0, %v327_v45, 0.0  ;;  %v1513_v62 = vsel %vm1336_vm6, %v1512_v17, %v3880_v12  ;;  %v896_v12 = vmul.f32 0.020408163, %v3934_v29 }
 0x144   : > { %v3982_v27 = vpop.xlane.xlu1 %600  ;;  %v803_v19 = vsel %vm328_vm0, %v326_v61, 0.0  ;;  %v867_v61 = vmul.f32 0.020408163, %v3942_v46  ;;  %2853 = vmatprep.subr.bf16.mxu0 %v2852_v5  ;;  %v1518_v3 = vsel %vm1343_vm7, %v1517_v6, %v1513_v62  ;;  %v880_v29 = vmul.f32 0.020408163, %v3948_v54 }
 0x145   : > { %v1754_v41 = vrot.slane %v896_v12, %v3428_v25 }
 0x146   : > { %747 = vadd.xlane.f32.xlu0 %v746_v33  ;;  %v800_v33 = vsel %vm328_vm0, %v325_v21, 0.0  ;;  %v866_v21 = vmul.f32 0.020408163, %v3926_v2  ;;  %v1665_v2 = vrot.slane %v878_v34, %v3422_v23  ;;  %v869_v34 = vmul.f32 0.020408163, %v3974_v8 }
 0x147   : > { %798 = vadd.xlane.f32.xlu1 %v797_v52  ;;  %v3995_v31 = vpop.xlane.xlu0 %462 }
 0x148   : > { %v514_v32 = vpop.xlane.xlu1 %513  ;;  %v1606_v46 = vrot.slane %v866_v21, %v3445_v42 }
 0x149   : > { %v870_v17 = vmul.f32 0.020408163, %v514_v32  ;;  %v897_v32 = vmul.f32 0.020408163, %v3950_v7 }
 0x14a   : > { %660 = vadd.xlane.f32.xlu0 %v659_v13  ;;  %v895_v13 = vmul.f32 0.020408163, %v3918_v4  ;;  %v755_v4 = vsel %vm328_vm0, %v310_v36, 0.0  ;;  %v868_v36 = vmul.f32 0.020408163, %v3958_v60  ;;  %v1666_v60 = vsel %vm1329_vm5, %v1665_v2, %v3909_v40 }
 0x14b   : > { %711 = vadd.xlane.f32.xlu1 %v710_v16  ;;  %v4012_v52 = vpop.xlane.xlu0 %552  ;;  %v311_v16 = vld [vmem:[%s3062_s28 + $0x478] sm:$0xff]  ;;  %v1523_v40 = vsel %vm1350_vm8, %v1522_v9, %v1518_v3  ;;  %v1626_v54 = vrot.slane %v870_v17, %v3534_v55  ;;  %v1675_v2 = vrot.slane %v880_v29, %v3428_v25  ;;  %v882_v17 = vmul.f32 0.020408163, %v3980_v51 }
 0x14c   : > { %v4014_v49 = vpop.xlane.xlu1 %603  ;;  %v758_v0 = vsel %vm328_vm0, %v311_v16, 0.0  ;;  %v879_v16 = vmul.f32 0.020408163, %v3932_v57 }
 0x14e   : > { %750 = vadd.xlane.f32.xlu0 %v749_v30  ;;  %v1597_v30 = vsel %vm1343_vm7, %v1596_v22, %v1592_v37  ;;  %v850_v22 = vmul.f32 0.020408163, %v3940_v58  ;;  %v1670_v21 = vrot.slane %v879_v16, %v3425_v24 }
 0x14f   : > { %801 = vadd.xlane.f32.xlu1 %v800_v33  ;;  %v466_v10 = vpop.xlane.xlu0 %465  ;;  %v1749_v33 = vrot.slane %v895_v13, %v3425_v24  ;;  %v1602_v45 = vsel %vm1350_vm8, %v1601_v39, %v1597_v30  ;;  %v1611_v13 = vrot.slane %v867_v61, %v3464_v53  ;;  %v852_v39 = vmul.f32 0.020408163, %v3972_v48 }
 0x150   : > { %v517_v1 = vpop.xlane.xlu1 %516  ;;  %v1607_v58 = vsel %vm1357_vm9, %v1606_v46, %v1602_v45  ;;  %v1527_v7 = vrot.slane %v850_v22, %v3445_v42  ;;  %v1759_v61 = vrot.slane %v897_v32, %v3431_v28  ;;  %v853_v30 = vmul.f32 0.020408163, %v3995_v31  ;;  %v1066_v32 = vld [vmem:[%s4539_s1 + $0x308] sm:$0xff] }
 0x151   : > { %v871_v6 = vmul.f32 0.020408163, %v517_v1  ;;  %v1750_v57 = vsel %vm1336_vm6, %v1749_v33, %v3912_v44  ;;  %v1621_v1 = vrot.slane %v869_v34, %v3523_v50  ;;  %v881_v44 = vmul.f32 0.020408163, %v3964_v43 }
 0x152   : > { %663 = vadd.xlane.f32.xlu0 %v662_v15  ;;  %v1616_v15 = vrot.slane %v868_v36, %v3520_v35  ;;  %v1612_v26 = vsel %vm1364_vm10, %v1611_v13, %v1607_v58  ;;  %v854_v36 = vmul.f32 0.020408163, %v466_v10  ;;  %v1671_v46 = vsel %vm1336_vm6, %v1670_v21, %v1666_v60 }
 0x153   : > { %753 = vadd.xlane.f32.xlu1 %v752_v47  ;;  %v4058_v20 = vpop.xlane.xlu0 %555  ;;  %v851_v47 = vmul.f32 0.020408163, %v3956_v14  ;;  %v1631_v14 = vrot.slane %v871_v6, %v3537_v56  ;;  %v1680_v33 = vrot.slane %v881_v44, %v3431_v28  ;;  %v1537_v34 = vrot.slane %v852_v39, %v3520_v35 }
 0x154   : > { %v4060_v8 = vpop.xlane.xlu1 %606  ;;  %v1617_v43 = vsel %vm1371_vm11, %v1616_v15, %v1612_v26  ;;  %v1755_v12 = vsel %vm1343_vm7, %v1754_v41, %v1750_v57  ;;  %v899_v10 = vmul.f32 0.020408163, %v3982_v27  ;;  %v1676_v22 = vsel %vm1343_vm7, %v1675_v2, %v1671_v46  ;;  %v1065_v57 = vld [vmem:[%s4539_s1 + $0x300] sm:$0xff]  ;;  %v1083_v26 = vld [vmem:[%s4539_s1 + $0x390] sm:$0xff] }
 0x155   : > { %v1622_v48 = vsel %vm1378_vm12, %v1621_v1, %v1617_v43  ;;  %v1760_v60 = vsel %vm1350_vm8, %v1759_v61, %v1755_v12  ;;  %v1542_v13 = vrot.slane %v853_v30, %v3523_v50  ;;  %v1681_v29 = vsel %vm1350_vm8, %v1680_v33, %v1676_v22  ;;  %v1068_v33 = vld [vmem:[%s4539_s1 + $0x318] sm:$0xff] }
 0x156   : > { %804 = vadd.xlane.f32.xlu0 %v803_v19  ;;  %v1532_v19 = vrot.slane %v851_v47, %v3464_v53  ;;  %v1627_v9 = vsel %vm1385_vm13, %v1626_v54, %v1622_v48  ;;  %v1547_v27 = vrot.slane %v854_v36, %v3534_v55  ;;  %v900_v58 = vmul.f32 0.020408163, %v4014_v49 }
 0x157   : > { %756 = vadd.xlane.f32.xlu1 %v755_v4  ;;  %v469_v5 = vpop.xlane.xlu0 %468  ;;  %v4084_v4 = vmul.f32 0.020408163, %v3966_v38  ;;  %v1632_v31 = vsel %vm1392_vm14, %v1631_v14, %v1627_v9  ;;  %v1685_v41 = vrot.slane %v882_v17, %v3445_v42  ;;  %v1769_v44 = vrot.slane %v899_v10, %v3464_v53  ;;  %v1069_v17 = vld [vmem:[%s4539_s1 + $0x320] sm:$0xff] }
 0x158   : > { %v520_v37 = vpop.xlane.xlu1 %519  ;;  %v855_v45 = vmul.f32 0.020408163, %v469_v5  ;;  %v884_v54 = vmul.f32 0.020408163, %v4058_v20  ;;  %v901_v39 = vmul.f32 0.020408163, %v4060_v8  ;;  %v2822_v5 = vpack.c.bf16 %v1066_v32, %v1065_v57 }
 0x159   : > { %v872_v62 = vmul.f32 0.020408163, %v520_v37  ;;  %v1764_v51 = vrot.slane %v4084_v4, %v3445_v42  ;;  %v1067_v8 = vld [vmem:[%s4539_s1 + $0x310] sm:$0xff] }
 0x15a   : > { %807 = vadd.xlane.f32.xlu0 %v806_v11  ;;  %v1552_v47 = vrot.slane %v855_v45, %v3537_v56  ;;  %v1695_v36 = vrot.slane %v884_v54, %v3520_v35  ;;  %v1086_v45 = vld [vmem:[%s4539_s1 + $0x3a8] sm:$0xff]  ;;  %v2826_v22 = vpack.c.bf16 %v1068_v33, %v1067_v8  ;;  %v1116_v54 = vld [vmem:[%s4539_s1 + $0x498] sm:$0xff] }
 0x15b   : > { %v1636_v3 = vrot.slane %v872_v62, %v3557_v18  ;;  %759 = vadd.xlane.f32.xlu1 %v758_v0  ;;  %v559_v38 = vpop.xlane.xlu0 %558  ;;  %v1528_v0 = vsel %vm1357_vm9, %v1527_v7, %v1523_v40  ;;  %v883_v40 = vmul.f32 0.020408163, %v4012_v52  ;;  %v1084_v52 = vld [vmem:[%s4539_s1 + $0x398] sm:$0xff]  ;;  %v1774_v62 = vrot.slane %v900_v58, %v3520_v35 }
 0x15c   : > { %v610_v16 = vpop.xlane.xlu1 %609  ;;  %v1533_v6 = vsel %vm1364_vm10, %v1532_v19, %v1528_v0  ;;  %v885_v14 = vmul.f32 0.020408163, %v559_v38  ;;  %v2824_v48 = vpack.c.bf16 %v1084_v52, %v1083_v26  ;;  %v1765_v38 = vsel %vm1357_vm9, %v1764_v51, %v1760_v60  ;;  %v1070_v60 = vld [vmem:[%s4539_s1 + $0x328] sm:$0xff]  ;;  %v1088_v58 = vld [vmem:[%s4539_s1 + $0x3b8] sm:$0xff] }
 0x15d   : > { %v1637_v11 = vsel %vm1399_vm15, %v1636_v3, %v1632_v31  ;;  %v1538_v15 = vsel %vm1371_vm11, %v1537_v34, %v1533_v6  ;;  %v902_v37 = vmul.f32 0.020408163, %v610_v16  ;;  %v1690_v43 = vrot.slane %v883_v40, %v3464_v53  ;;  %v1085_v34 = vld [vmem:[%s4539_s1 + $0x3a0] sm:$0xff]  ;;  %v1098_v6 = vld [vmem:[%s4539_s1 + $0x408] sm:$0xff]  ;;  %v1087_v40 = vld [vmem:[%s4539_s1 + $0x3b0] sm:$0xff] }
 0x15e   : > { %2256 = vmatprep.mubr.f32.mxu1 %v1637_v11  ;;  %v1543_v49 = vsel %vm1378_vm12, %v1542_v13, %v1538_v15  ;;  %v1686_v16 = vsel %vm1357_vm9, %v1685_v41, %v1681_v29  ;;  %v1779_v31 = vrot.slane %v901_v39, %v3523_v50  ;;  %v1700_v12 = vrot.slane %v885_v14, %v3523_v50  ;;  %v1097_v13 = vld [vmem:[%s4539_s1 + $0x400] sm:$0xff]  ;;  %v1100_v8 = vld [vmem:[%s4539_s1 + $0x418] sm:$0xff] }
 0x15f   : > { %v472_v1 = vpop.xlane.xlu0 %471  ;;  %v1548_v20 = vsel %vm1385_vm13, %v1547_v27, %v1543_v49  ;;  %v1770_v10 = vsel %vm1364_vm10, %v1769_v44, %v1765_v38  ;;  %v1784_v11 = vrot.slane %v902_v37, %v3534_v55  ;;  %v1691_v29 = vsel %vm1364_vm10, %v1690_v43, %v1686_v16  ;;  %v1115_v44 = vld [vmem:[%s4539_s1 + $0x490] sm:$0xff]  ;;  %v1118_v38 = vld [vmem:[%s4539_s1 + $0x4a8] sm:$0xff] }
 0x160   : > { %v562_v21 = vpop.xlane.xlu1 %561  ;;  %v856_v7 = vmul.f32 0.020408163, %v472_v1  ;;  %v1553_v30 = vsel %vm1392_vm14, %v1552_v47, %v1548_v20  ;;  %v2828_v15 = vpack.c.bf16 %v1086_v45, %v1085_v34  ;;  %v1775_v47 = vsel %vm1371_vm11, %v1774_v62, %v1770_v10  ;;  %v1090_v34 = vld [vmem:[%s4539_s1 + $0x3c8] sm:$0xff]  ;;  %v1117_v45 = vld [vmem:[%s4539_s1 + $0x4a0] sm:$0xff] }
 0x161   : > { %v886_v61 = vmul.f32 0.020408163, %v562_v21  ;;  %v1696_v1 = vsel %vm1371_vm11, %v1695_v36, %v1691_v29  ;;  %v2830_v52 = vpack.c.bf16 %v1070_v60, %v1069_v17  ;;  %v2854_v49 = vpack.c.bf16 %v1098_v6, %v1097_v13  ;;  %v1073_v17 = vld [vmem:[%s4539_s1 + $0x340] sm:$0xff]  ;;  %v1074_v60 = vld [vmem:[%s4539_s1 + $0x348] sm:$0xff] }
 0x162   : > { %v1557_v2 = vrot.slane %v856_v7, %v3557_v18  ;;  %v1780_v7 = vsel %vm1378_vm12, %v1779_v31, %v1775_v47  ;;  %v1701_v26 = vsel %vm1378_vm12, %v1700_v12, %v1696_v1  ;;  %v1101_v13 = vld [vmem:[%s4539_s1 + $0x420] sm:$0xff]  ;;  %v1102_v6 = vld [vmem:[%s4539_s1 + $0x428] sm:$0xff] }
 0x163   : > { %v613_v19 = vpop.xlane.xlu0 %612  ;;  %v1705_v0 = vrot.slane %v886_v61, %v3534_v55  ;;  %v1785_v37 = vsel %vm1385_vm13, %v1784_v11, %v1780_v7  ;;  %v2862_v7 = vpack.c.bf16 %v1102_v6, %v1101_v13 }
 0x164   : > { %v565_v4 = vpop.xlane.xlu1 %564  ;;  %v903_v3 = vmul.f32 0.020408163, %v613_v19  ;;  %v1558_v46 = vsel %vm1399_vm15, %v1557_v2, %v1553_v30  ;;  %v1071_v2 = vld [vmem:[%s4539_s1 + $0x330] sm:$0xff]  ;;  %v2832_v19 = vpack.c.bf16 %v1088_v58, %v1087_v40  ;;  %v2856_v30 = vpack.c.bf16 %v1116_v54, %v1115_v44  ;;  %v1120_v58 = vld [vmem:[%s4539_s1 + $0x4b8] sm:$0xff] }
 0x165   : > { %v887_v9 = vmul.f32 0.020408163, %v565_v4  ;;  %2257 = vmatmul.mubr.f32.vlgmr.msra.gmra.mrb[0].mxu1 %v1558_v46  ;;  %v1706_v39 = vsel %vm1385_vm13, %v1705_v0, %v1701_v26  ;;  %v1072_v4 = vld [vmem:[%s4539_s1 + $0x338] sm:$0xff]  ;;  %v1089_v46 = vld [vmem:[%s4539_s1 + $0x3c0] sm:$0xff]  ;;  %v1119_v40 = vld [vmem:[%s4539_s1 + $0x4b0] sm:$0xff] }
 0x166   : > { %2823 = vmatpush3.bf16.msra.mxu1 %v2822_v5  ;;  %v1789_v51 = vrot.slane %v903_v3, %v3537_v56  ;;  %v2834_v12 = vpack.c.bf16 %v1072_v4, %v1071_v2  ;;  %v2864_v2 = vpack.c.bf16 %v1120_v58, %v1119_v40 }
 0x167   : > { %v1710_v27 = vrot.slane %v887_v9, %v3537_v56  ;;  %v616_v57 = vpop.xlane.xlu0 %615  ;;  %2825 = vmatprep.subr.bf16.mxu1 %v2824_v48  ;;  %v1099_v48 = vld [vmem:[%s4539_s1 + $0x410] sm:$0xff] }
 0x168   : > { %v568_v32 = vpop.xlane.xlu1 %567  ;;  %v904_v21 = vmul.f32 0.020408163, %v616_v57  ;;  %v1790_v43 = vsel %vm1392_vm14, %v1789_v51, %v1785_v37  ;;  %v2858_v0 = vpack.c.bf16 %v1100_v8, %v1099_v48  ;;  %v2860_v57 = vpack.c.bf16 %v1118_v38, %v1117_v45 }
 0x169   : > { %v888_v41 = vmul.f32 0.020408163, %v568_v32  ;;  %v1711_v62 = vsel %vm1392_vm14, %v1710_v27, %v1706_v39  ;;  %v1091_v32 = vld [vmem:[%s4539_s1 + $0x3d0] sm:$0xff]  ;;  %v1104_v39 = vld [vmem:[%s4539_s1 + $0x438] sm:$0xff] }
 0x16a   : > { %v1794_v14 = vrot.slane %v904_v21, %v3557_v18  ;;  %2827 = vmatpush3.bf16.msra.mxu1 %v2826_v22  ;;  %v2836_v22 = vpack.c.bf16 %v1090_v34, %v1089_v46  ;;  %v2838_v21 = vpack.c.bf16 %v1074_v60, %v1073_v17  ;;  %v1078_v46 = vld [vmem:[%s4539_s1 + $0x368] sm:$0xff]  ;;  %v1105_v34 = vld [vmem:[%s4539_s1 + $0x440] sm:$0xff]  ;;  %v1095_v17 = vld [vmem:[%s4539_s1 + $0x3f0] sm:$0xff] }
 0x16b   : > { %v1715_v5 = vrot.slane %v888_v41, %v3557_v18  ;;  %v667_v61 = vpop.xlane.xlu0 %666  ;;  %2829 = vmatprep.subr.bf16.mxu1 %v2828_v15  ;;  %v1092_v15 = vld [vmem:[%s4539_s1 + $0x3d8] sm:$0xff]  ;;  %v1075_v41 = vld [vmem:[%s4539_s1 + $0x350] sm:$0xff] }
 0x16c   : > { %v670_v20 = vpop.xlane.xlu1 %669  ;;  %v921_v33 = vmul.f32 0.020408163, %v667_v61  ;;  %v1795_v3 = vsel %vm1399_vm15, %v1794_v14, %v1790_v43  ;;  %v2840_v26 = vpack.c.bf16 %v1092_v15, %v1091_v32  ;;  %v1093_v61 = vld [vmem:[%s4539_s1 + $0x3e0] sm:$0xff]  ;;  %v1079_v32 = vld [vmem:[%s4539_s1 + $0x370] sm:$0xff]  ;;  %v1080_v15 = vld [vmem:[%s4539_s1 + $0x378] sm:$0xff] }
 0x16d   : > { %v922_v36 = vmul.f32 0.020408163, %v670_v20  ;;  %v1716_v9 = vsel %vm1399_vm15, %v1715_v5, %v1711_v62  ;;  %2326 = vmatprep.mubr.f32.mxu0 %v1795_v3  ;;  %v1094_v20 = vld [vmem:[%s4539_s1 + $0x3e8] sm:$0xff]  ;;  %v1121_v43 = vld [vmem:[%s4539_s1 + $0x4c0] sm:$0xff] }
 0x16e   : > { %v1878_v16 = vrot.slane %v921_v33, %v3388_v59  ;;  %2327 = vmatmul.mubr.f32.vlgmr.msra.gmra.mrb[2].mxu0 %v1716_v9  ;;  %2831 = vmatpush3.bf16.msra.mxu1 %v2830_v52  ;;  %v1076_v52 = vld [vmem:[%s4539_s1 + $0x358] sm:$0xff]  ;;  %v1122_v62 = vld [vmem:[%s4539_s1 + $0x4c8] sm:$0xff]  ;;  %v2844_v3 = vpack.c.bf16 %v1094_v20, %v1093_v61  ;;  %v1077_v9 = vld [vmem:[%s4539_s1 + $0x360] sm:$0xff] }
 0x16f   : > { %v1882_v31 = vrot.slane %v922_v36, %v3392_v63  ;;  %v619_v10 = vpop.xlane.xlu0 %618  ;;  %2855 = vmatpush3.bf16.msra.mxu0 %v2854_v49  ;;  %2833 = vmatprep.subr.bf16.mxu1 %v2832_v19  ;;  %v1103_v49 = vld [vmem:[%s4539_s1 + $0x430] sm:$0xff]  ;;  %v4553_v19 = vld [vmem:[#allocation5_spill] sm:$0xff]  ;;  %v2842_v48 = vpack.c.bf16 %v1076_v52, %v1075_v41  ;;  %v2846_v6 = vpack.c.bf16 %v1078_v46, %v1077_v9  ;;  %v1108_v41 = vld [vmem:[%s4539_s1 + $0x458] sm:$0xff] }
 0x170   : > { %v622_v11 = vpop.xlane.xlu1 %621  ;;  %v905_v51 = vmul.f32 0.020408163, %v619_v10  ;;  %2857 = vmatprep.subr.bf16.mxu0 %v2856_v30  ;;  %v2866_v36 = vpack.c.bf16 %v1104_v39, %v1103_v49  ;;  %v1096_v10 = vld [vmem:[%s4539_s1 + $0x3f8] sm:$0xff]  ;;  %v2850_v49 = vpack.c.bf16 %v1080_v15, %v1079_v32 }
 0x171   : > { %v1883_v29 = vsel %vm1301_vm1, %v1882_v31, %v1878_v16  ;;  %v906_v27 = vmul.f32 0.020408163, %v622_v11  ;;  %v2868_v31 = vpack.c.bf16 %v1122_v62, %v1121_v43  ;;  %v1123_v11 = vld [vmem:[%s4539_s1 + $0x4d0] sm:$0xff]  ;;  %v1109_v43 = vld [vmem:[%s4539_s1 + $0x460] sm:$0xff]  ;;  %v1110_v62 = vld [vmem:[%s4539_s1 + $0x468] sm:$0xff] }
 0x172   : > { %v1799_v47 = vrot.slane %v905_v51, %v3388_v59  ;;  %2835 = vmatpush3.bf16.msra.mxu1 %v2834_v12  ;;  %v1106_v12 = vld [vmem:[%s4539_s1 + $0x448] sm:$0xff]  ;;  %v2878_v9 = vpack.c.bf16 %v1110_v62, %v1109_v43 }
 0x173   : > { %v1803_v1 = vrot.slane %v906_v27, %v3392_v63  ;;  %v673_v44 = vpop.xlane.xlu0 %672  ;;  %2859 = vmatpush3.bf16.msra.mxu0 %v2858_v0  ;;  %2837 = vmatprep.subr.bf16.mxu1 %v2836_v22  ;;  %v1124_v0 = vld [vmem:[%s4539_s1 + $0x4d8] sm:$0xff]  ;;  %v4554_v22 = vld [vmem:[#allocation6_spill] sm:$0xff]  ;;  %v2870_v27 = vpack.c.bf16 %v1106_v12, %v1105_v34 }
 0x174   : > { %v625_v54 = vpop.xlane.xlu1 %624  ;;  %v923_v5 = vmul.f32 0.020408163, %v673_v44  ;;  %2861 = vmatprep.subr.bf16.mxu0 %v2860_v57  ;;  %v2848_v57 = vpack.c.bf16 %v1096_v10, %v1095_v17  ;;  %v1125_v44 = vld [vmem:[%s4539_s1 + $0x4e0] sm:$0xff] }
 0x175   : > { %v1804_v14 = vsel %vm1301_vm1, %v1803_v1, %v1799_v47  ;;  %v907_v37 = vmul.f32 0.020408163, %v625_v54  ;;  %v2872_v1 = vpack.c.bf16 %v1124_v0, %v1123_v11  ;;  %v1126_v54 = vld [vmem:[%s4539_s1 + $0x4e8] sm:$0xff] }
 0x176   : > { %v1887_v4 = vrot.slane %v923_v5, %v4553_v19  ;;  %2839 = vmatpush3.bf16.msra.mxu1 %v2838_v21  ;;  %v1107_v21 = vld [vmem:[%s4539_s1 + $0x450] sm:$0xff]  ;;  %v2876_v20 = vpack.c.bf16 %v1126_v54, %v1125_v44 }
 0x177   : > { %v1808_v30 = vrot.slane %v907_v37, %v4553_v19  ;;  %v676_v8 = vpop.xlane.xlu0 %675  ;;  %2863 = vmatpush3.bf16.msra.mxu0 %v2862_v7  ;;  %2841 = vmatprep.subr.bf16.mxu1 %v2840_v26  ;;  %v2874_v5 = vpack.c.bf16 %v1108_v41, %v1107_v21 }
 0x178   : > { %v763_v33 = vpop.xlane.xlu1 %762  ;;  %v1888_v45 = vsel %vm1308_vm2, %v1887_v4, %v1883_v29  ;;  %v924_v16 = vmul.f32 0.020408163, %v676_v8  ;;  %2865 = vmatprep.subr.bf16.mxu0 %v2864_v2  ;;  %v1127_v4 = vld [vmem:[%s4539_s1 + $0x4f0] sm:$0xff] }
 0x179   : > { %v1809_v38 = vsel %vm1308_vm2, %v1808_v30, %v1804_v14  ;;  %v953_v13 = vmul.f32 0.020408163, %v763_v33  ;;  %v1128_v30 = vld [vmem:[%s4539_s1 + $0x4f8] sm:$0xff] }
 0x17a   : > { %v1892_v60 = vrot.slane %v924_v16, %v4554_v22  ;;  %2843 = vmatpush3.bf16.msra.mxu1 %v2842_v48  ;;  %v4555_v48 = vld [vmem:[#allocation7_spill] sm:$0xff] }
 0x17b   : > { %v766_v29 = vpop.xlane.xlu0 %765  ;;  %2867 = vmatpush3.bf16.msra.mxu0 %v2866_v36  ;;  %2845 = vmatprep.subr.bf16.mxu1 %v2844_v3  ;;  %v2036_v7 = vrot.slane %v953_v13, %v3388_v59  ;;  %v1111_v16 = vld [vmem:[%s4539_s1 + $0x470] sm:$0xff] }
 0x17c   : > { %v628_v51 = vpop.xlane.xlu1 %627  ;;  %v1893_v40 = vsel %vm1315_vm3, %v1892_v60, %v1888_v45  ;;  %v954_v58 = vmul.f32 0.020408163, %v766_v29  ;;  %2869 = vmatprep.subr.bf16.mxu0 %v2868_v31  ;;  %v1112_v31 = vld [vmem:[%s4539_s1 + $0x478] sm:$0xff] }
 0x17d   : > { %v908_v47 = vmul.f32 0.020408163, %v628_v51  ;;  %v2882_v60 = vpack.c.bf16 %v1112_v31, %v1111_v16 }
 0x17e   : > { %v2040_v26 = vrot.slane %v954_v58, %v3392_v63  ;;  %2847 = vmatpush3.bf16.msra.mxu1 %v2846_v6 }
 0x17f   : > { %v1813_v52 = vrot.slane %v908_v47, %v4554_v22  ;;  %v679_v39 = vpop.xlane.xlu0 %678  ;;  %2871 = vmatpush3.bf16.msra.mxu0 %v2870_v27  ;;  %2849 = vmatprep.subr.bf16.mxu1 %v2848_v57 }
 0x180   : > { %v715_v14 = vpop.xlane.xlu1 %714  ;;  %v2041_v37 = vsel %vm1301_vm1, %v2040_v26, %v2036_v7  ;;  %v925_v61 = vmul.f32 0.020408163, %v679_v39  ;;  %2873 = vmatprep.subr.bf16.mxu0 %v2872_v1 }
 0x181   : > { %v1814_v2 = vsel %vm1315_vm3, %v1813_v52, %v1809_v38  ;;  %v937_v33 = vmul.f32 0.020408163, %v715_v14  ;;  %v2880_v38 = vpack.c.bf16 %v1128_v30, %v1127_v4 }
 0x182   : > { %v1897_v8 = vrot.slane %v925_v61, %v4555_v48  ;;  %2851 = vmatpush3.bf16.msra.mxu1 %v2850_v49 }
 0x183   : > { %v718_v36 = vpop.xlane.xlu0 %717  ;;  %2875 = vmatpush3.bf16.msra.mxu0 %v2874_v5  ;;  %v1957_v12 = vrot.slane %v937_v33, %v3388_v59 }
 0x184   : > { %v769_v3 = vpop.xlane.xlu1 %768  ;;  %v1898_v46 = vsel %vm1322_vm4, %v1897_v8, %v1893_v40  ;;  %v938_v34 = vmul.f32 0.020408163, %v718_v36  ;;  %2877 = vmatprep.subr.bf16.mxu0 %v2876_v20 }
 0x185   : > { %v955_v45 = vmul.f32 0.020408163, %v769_v3 }
 0x186   : > { %v1961_v17 = vrot.slane %v938_v34, %v3392_v63 }
 0x187   : > { %v2045_v10 = vrot.slane %v955_v45, %v4553_v19  ;;  %v631_v11 = vpop.xlane.xlu0 %630  ;;  %2879 = vmatpush3.bf16.msra.mxu0 %v2878_v9 }
 0x188   : > { %v682_v0 = vpop.xlane.xlu1 %681  ;;  %v1962_v13 = vsel %vm1301_vm1, %v1961_v17, %v1957_v12  ;;  %v909_v29 = vmul.f32 0.020408163, %v631_v11  ;;  %2881 = vmatprep.subr.bf16.mxu0 %v2880_v38 }
 0x189   : > { %v2046_v6 = vsel %vm1308_vm2, %v2045_v10, %v2041_v37  ;;  %v926_v51 = vmul.f32 0.020408163, %v682_v0 }
 0x18a   : > { %v1818_v27 = vrot.slane %v909_v29, %v4555_v48 }
 0x18b   : > { %v1902_v57 = vrot.slane %v926_v51, %v3422_v23  ;;  %v721_v59 = vpop.xlane.xlu0 %720  ;;  %2883 = vmatpush3.bf16.msra.mxu0 %v2882_v60 }
 0x18c   : > { %v772_v32 = vpop.xlane.xlu1 %771  ;;  %v1819_v63 = vsel %vm1322_vm4, %v1818_v27, %v1814_v2  ;;  %v939_v40 = vmul.f32 0.020408163, %v721_v59 }
 0x18d   : > { %v4353_v15 = vsel %vm1329_vm5, %v1902_v57, %v1898_v46  ;;  %v956_v58 = vmul.f32 0.020408163, %v772_v32 }
 0x18e   : > { %v1966_v47 = vrot.slane %v939_v40, %v4553_v19 }
 0x18f   : > { %v2050_v1 = vrot.slane %v956_v58, %v4554_v22  ;;  %v634_v21 = vpop.xlane.xlu0 %633 }
 0x190   : > { %v685_v41 = vpop.xlane.xlu1 %684  ;;  %v1967_v44 = vsel %vm1308_vm2, %v1966_v47, %v1962_v13  ;;  %v910_v7 = vmul.f32 0.020408163, %v634_v21 }
 0x191   : > { %v2051_v54 = vsel %vm1315_vm3, %v2050_v1, %v2046_v6  ;;  %v927_v58 = vmul.f32 0.020408163, %v685_v41 }
 0x192   : > { %v1823_v26 = vrot.slane %v910_v7, %v3422_v23 }
 0x193   : > { %v724_v52 = vpop.xlane.xlu0 %723 }
 0x194   : > { %v775_v49 = vpop.xlane.xlu1 %774  ;;  %v4361_v39 = vsel %vm1329_vm5, %v1823_v26, %v1819_v63  ;;  %v940_v14 = vmul.f32 0.020408163, %v724_v52 }
 0x195   : > { %v957_v5 = vmul.f32 0.020408163, %v775_v49 }
 0x196   : > { %v1971_v19 = vrot.slane %v940_v14, %v4554_v22 }
 0x197   : > { %v2055_v37 = vrot.slane %v957_v5, %v4555_v48  ;;  %v637_v2 = vpop.xlane.xlu0 %636 }
 0x198   : > { %v688_v61 = vpop.xlane.xlu1 %687  ;;  %v1972_v20 = vsel %vm1315_vm3, %v1971_v19, %v1967_v44  ;;  %v911_v1 = vmul.f32 0.020408163, %v637_v2 }
 0x199   : > { %v2056_v43 = vsel %vm1322_vm4, %v2055_v37, %v2051_v54  ;;  %v928_v21 = vmul.f32 0.020408163, %v688_v61  ;;  %v1907_v54 = vrot.slane %v927_v58, %v3425_v24 }
 0x19a   : > { %v1828_v5 = vrot.slane %v911_v1, %v3425_v24 }
 0x19b   : > { %v727_v62 = vpop.xlane.xlu0 %726  ;;  %v1912_v19 = vrot.slane %v928_v21, %v3428_v25  ;;  %v1908_v2 = vsel %vm1336_vm6, %v1907_v54, %v4353_v15 }
 0x19c   : > { %v778_v4 = vpop.xlane.xlu1 %777  ;;  %v941_v30 = vmul.f32 0.020408163, %v727_v62 }
 0x19d   : > { %v958_v8 = vmul.f32 0.020408163, %v778_v4 }
 0x19e   : > { %v1976_v33 = vrot.slane %v941_v30, %v4555_v48 }
 0x19f   : > { %v2060_v36 = vrot.slane %v958_v8, %v3422_v23  ;;  %v640_v3 = vpop.xlane.xlu0 %639 }
 0x1a0   : > { %v691_v9 = vpop.xlane.xlu1 %690  ;;  %v4370_v22 = vsel %vm1322_vm4, %v1976_v33, %v1972_v20  ;;  %v912_v7 = vmul.f32 0.020408163, %v640_v3  ;;  %v1913_v3 = vsel %vm1343_vm7, %v1912_v19, %v1908_v2 }
 0x1a1   : > { %v4373_v46 = vsel %vm1329_vm5, %v2060_v36, %v2056_v43  ;;  %v929_v52 = vmul.f32 0.020408163, %v691_v9  ;;  %v1829_v36 = vsel %vm1336_vm6, %v1828_v5, %v4361_v39 }
 0x1a2   : > { %v1833_v61 = vrot.slane %v912_v7, %v3428_v25 }
 0x1a3   : > { %v730_v34 = vpop.xlane.xlu0 %729  ;;  %v1917_v4 = vrot.slane %v929_v52, %v3431_v28 }
 0x1a4   : > { %v781_v45 = vpop.xlane.xlu1 %780  ;;  %v942_v49 = vmul.f32 0.020408163, %v730_v34 }
 0x1a5   : > { %v959_v14 = vmul.f32 0.020408163, %v781_v45  ;;  %v1918_v39 = vsel %vm1350_vm8, %v1917_v4, %v1913_v3 }
 0x1a6   : > { %v1981_v30 = vrot.slane %v942_v49, %v3422_v23  ;;  %v1834_v23 = vsel %vm1343_vm7, %v1833_v61, %v1829_v36 }
 0x1a7   : > { %v643_v38 = vpop.xlane.xlu0 %642  ;;  %v2065_v8 = vrot.slane %v959_v14, %v3425_v24 }
 0x1a8   : > { %v694_v16 = vpop.xlane.xlu1 %693  ;;  %v913_v37 = vmul.f32 0.020408163, %v643_v38  ;;  %v1982_v1 = vsel %vm1329_vm5, %v1981_v30, %v4370_v22 }
 0x1a9   : > { %v930_v20 = vmul.f32 0.020408163, %v694_v16 }
 0x1aa   : > { %v1838_v9 = vrot.slane %v913_v37, %v3431_v28 }
 0x1ab   : > { %v733_v31 = vpop.xlane.xlu0 %732  ;;  %v1922_v15 = vrot.slane %v930_v20, %v3445_v42 }
 0x1ac   : > { %v784_v12 = vpop.xlane.xlu1 %783  ;;  %v943_v45 = vmul.f32 0.020408163, %v733_v31 }
 0x1ad   : > { %v960_v38 = vmul.f32 0.020408163, %v784_v12  ;;  %v1839_v12 = vsel %vm1350_vm8, %v1838_v9, %v1834_v23  ;;  %v1923_v54 = vsel %vm1357_vm9, %v1922_v15, %v1918_v39 }
 0x1ae   : > { %v1986_v7 = vrot.slane %v943_v45, %v3425_v24 }
 0x1af   : > { %v646_v17 = vpop.xlane.xlu0 %645  ;;  %v2070_v52 = vrot.slane %v960_v38, %v3428_v25 }
 0x1b0   : > { %v697_v10 = vpop.xlane.xlu1 %696 }
 0x1b1   : > { %v931_v43 = vmul.f32 0.020408163, %v697_v10 }
 0x1b3   : > { %v736_v11 = vpop.xlane.xlu0 %735 }
 0x1b4   : > { %v4375_v48 = vpop.xlane.xlu1 %786 }
 0x1b7   : > { %v649_v0 = vpop.xlane.xlu0 %648 }
 0x1b8   : > { %v700_v60 = vpop.xlane.xlu1 %699  ;;  %v915_v21 = vmul.f32 0.020408163, %v649_v0  ;;  %v961_v0 = vmul.f32 0.020408163, %v4375_v48  ;;  %v1987_v48 = vsel %vm1336_vm6, %v1986_v7, %v1982_v1 }
 0x1b9   : > { %v932_v33 = vmul.f32 0.020408163, %v700_v60  ;;  %v1927_v60 = vrot.slane %v931_v43, %v3464_v53 }
 0x1ba   : > { %v1848_v61 = vrot.slane %v915_v21, %v3464_v53  ;;  %v2075_v45 = vrot.slane %v961_v0, %v3431_v28 }
 0x1bb   : > { %v4377_v13 = vpop.xlane.xlu0 %738  ;;  %v1932_v31 = vrot.slane %v932_v33, %v3520_v35 }
 0x1bc   : > { %v4379_v6 = vpop.xlane.xlu1 %789  ;;  %v945_v4 = vmul.f32 0.020408163, %v4377_v13 }
 0x1be   : > { %v1996_v23 = vrot.slane %v945_v4, %v3431_v28 }
 0x1bf   : > { %v652_v29 = vpop.xlane.xlu0 %651 }
 0x1c0   : > { %v703_v51 = vpop.xlane.xlu1 %702  ;;  %v916_v5 = vmul.f32 0.020408163, %v652_v29 }
 0x1c1   : > { %v2581_v27 = vpop.f32.mrb[0].mxu0  ;;  %v933_v34 = vmul.f32 0.020408163, %v703_v51  ;;  %v2066_v51 = vsel %vm1336_vm6, %v2065_v8, %v4373_v46  ;;  %v1928_v46 = vsel %vm1364_vm10, %v1927_v60, %v1923_v54 }
 0x1c2   : > { %v2582_v57 = vpop.f32.mrb[1].mxu0  ;;  %v1933_v37 = vsel %vm1371_vm11, %v1932_v31, %v1928_v46  ;;  %v1853_v36 = vrot.slane %v916_v5, %v3520_v35 }
 0x1c3   : > { %v4381_v59 = vpop.xlane.xlu0 %741  ;;  %v4383_v32 = vadd.f32 %v2582_v57, %v2581_v27  ;;  %v914_v27 = vmul.f32 0.020408163, %v646_v17  ;;  %v1937_v17 = vrot.slane %v933_v34, %v3523_v50 }
 0x1c4   : > { %v4385_v63 = vpop.xlane.xlu1 %792 }
 0x1c5   : > { %v1843_v14 = vrot.slane %v914_v27, %v3445_v42  ;;  %v1938_v43 = vsel %vm1378_vm12, %v1937_v17, %v1933_v37  ;;  %v946_v27 = vmul.f32 0.020408163, %v4381_v59  ;;  %v963_v60 = vmul.f32 0.020408163, %v4385_v63 }
 0x1c7   : > { %v655_v40 = vpop.xlane.xlu0 %654  ;;  %v1844_v9 = vsel %vm1357_vm9, %v1843_v14, %v1839_v12 }
 0x1c8   : > { %v706_v47 = vpop.xlane.xlu1 %705  ;;  %v917_v20 = vmul.f32 0.020408163, %v655_v40  ;;  %v2071_v40 = vsel %vm1343_vm7, %v2070_v52, %v2066_v51  ;;  %v1849_v38 = vsel %vm1364_vm10, %v1848_v61, %v1844_v9  ;;  %v2001_v52 = vrot.slane %v946_v27, %v3445_v42 }
 0x1c9   : > { %v934_v16 = vmul.f32 0.020408163, %v706_v47  ;;  %v944_v47 = vmul.f32 0.020408163, %v736_v11  ;;  %v1854_v39 = vsel %vm1371_vm11, %v1853_v36, %v1849_v38 }
 0x1ca   : > { %v1858_v13 = vrot.slane %v917_v20, %v3523_v50 }
 0x1cb   : > { %v4387_v44 = vpop.xlane.xlu0 %744  ;;  %v1942_v49 = vrot.slane %v934_v16, %v3534_v55  ;;  %v1991_v24 = vrot.slane %v944_v47, %v3428_v25 }
 0x1cc   : > { %v4390_v26 = vpop.xlane.xlu1 %795  ;;  %v947_v1 = vmul.f32 0.020408163, %v4387_v44  ;;  %v1859_v21 = vsel %vm1378_vm12, %v1858_v13, %v1854_v39  ;;  %v2085_v44 = vrot.slane %v963_v60, %v3464_v53 }
 0x1cd   : > { %v1943_v33 = vsel %vm1385_vm13, %v1942_v49, %v1938_v43  ;;  %v1992_v15 = vsel %vm1343_vm7, %v1991_v24, %v1987_v48  ;;  %v964_v51 = vmul.f32 0.020408163, %v4390_v26 }
 0x1ce   : > { %v2006_v14 = vrot.slane %v947_v1, %v3464_v53  ;;  %v1997_v37 = vsel %vm1350_vm8, %v1996_v23, %v1992_v15  ;;  %v1129_v15 = vld [vmem:[%s4540_s2] sm:$0x1] }
 0x1cf   : > { %v658_v41 = vpop.xlane.xlu0 %657  ;;  %v2090_v46 = vrot.slane %v964_v51, %v3520_v35  ;;  %v2002_v24 = vsel %vm1357_vm9, %v2001_v52, %v1997_v37 }
 0x1d0   : > { %v709_v62 = vpop.xlane.xlu1 %708  ;;  %v2007_v4 = vsel %vm1364_vm10, %v2006_v14, %v2002_v24 }
 0x1d1   : > { %v935_v57 = vmul.f32 0.020408163, %v709_v62  ;;  %v918_v62 = vmul.f32 0.020408163, %v658_v41  ;;  %v962_v41 = vmul.f32 0.020408163, %v4379_v6 }
 0x1d3   : > { %v4405_v10 = vpop.xlane.xlu0 %747  ;;  %v1947_v19 = vrot.slane %v935_v57, %v3537_v56  ;;  %v1863_v16 = vrot.slane %v918_v62, %v3534_v55  ;;  %v2080_v47 = vrot.slane %v962_v41, %v3445_v42 }
 0x1d4   : > { %v799_v58 = vpop.xlane.xlu1 %798  ;;  %v948_v28 = vmul.f32 0.020408163, %v4405_v10 }
 0x1d5   : > { %v1948_v3 = vsel %vm1392_vm14, %v1947_v19, %v1943_v33  ;;  %v965_v59 = vmul.f32 0.020408163, %v799_v58  ;;  %v1864_v63 = vsel %vm1385_vm13, %v1863_v16, %v1859_v21  ;;  %v2076_v19 = vsel %vm1350_vm8, %v2075_v45, %v2071_v40 }
 0x1d6   : > { %v2081_v20 = vsel %vm1357_vm9, %v2080_v47, %v2076_v19 }
 0x1d7   : > { %v661_v22 = vpop.xlane.xlu0 %660  ;;  %v2095_v42 = vrot.slane %v965_v59, %v3523_v50  ;;  %v2086_v61 = vsel %vm1364_vm10, %v2085_v44, %v2081_v20 }
 0x1d8   : > { %v712_v11 = vpop.xlane.xlu1 %711  ;;  %v919_v30 = vmul.f32 0.020408163, %v661_v22 }
 0x1d9   : > { %v936_v2 = vmul.f32 0.020408163, %v712_v11  ;;  %v2011_v11 = vrot.slane %v948_v28, %v3520_v35 }
 0x1da   : > { %v1868_v6 = vrot.slane %v919_v30, %v3537_v56  ;;  %v2091_v30 = vsel %vm1371_vm11, %v2090_v46, %v2086_v61 }
 0x1db   : > { %v1952_v29 = vrot.slane %v936_v2, %v3557_v18  ;;  %v751_v8 = vpop.xlane.xlu0 %750  ;;  %v2096_v48 = vsel %vm1378_vm12, %v2095_v42, %v2091_v30 }
 0x1dc   : > { %v802_v25 = vpop.xlane.xlu1 %801  ;;  %v949_v17 = vmul.f32 0.020408163, %v751_v8  ;;  %v1869_v22 = vsel %vm1392_vm14, %v1868_v6, %v1864_v63 }
 0x1dd   : > { %v1953_v34 = vsel %vm1399_vm15, %v1952_v29, %v1948_v3  ;;  %v966_v54 = vmul.f32 0.020408163, %v802_v25 }
 0x1de   : > { %2396 = vmatprep.mubr.f32.mxu1 %v1953_v34  ;;  %v2016_v53 = vrot.slane %v949_v17, %v3523_v50  ;;  %v2012_v50 = vsel %vm1371_vm11, %v2011_v11, %v2007_v4 }
 0x1df   : > { %v664_v57 = vpop.xlane.xlu0 %663  ;;  %v2100_v2 = vrot.slane %v966_v54, %v3534_v55 }
 0x1e0   : > { %v920_v31 = vmul.f32 0.020408163, %v664_v57  ;;  %v754_v12 = vpop.xlane.xlu1 %753  ;;  %v2017_v36 = vsel %vm1378_vm12, %v2016_v53, %v2012_v50 }
 0x1e1   : > { %v950_v26 = vmul.f32 0.020408163, %v754_v12  ;;  %v2101_v25 = vsel %vm1385_vm13, %v2100_v2, %v2096_v48 }
 0x1e2   : > { %v1873_v7 = vrot.slane %v920_v31, %v3557_v18 }
 0x1e3   : > { %v805_v49 = vpop.xlane.xlu0 %804  ;;  %v2021_v43 = vrot.slane %v950_v26, %v3534_v55 }
 0x1e4   : > { %v967_v10 = vmul.f32 0.020408163, %v805_v49  ;;  %v757_v58 = vpop.xlane.xlu1 %756  ;;  %v1874_v5 = vsel %vm1399_vm15, %v1873_v7, %v1869_v22 }
 0x1e5   : > { %v951_v0 = vmul.f32 0.020408163, %v757_v58  ;;  %2397 = vmatmul.mubr.f32.vlgmr.msra.gmra.mrb[2].mxu1 %v1874_v5  ;;  %v2022_v3 = vsel %vm1385_vm13, %v2021_v43, %v2017_v36 }
 0x1e6   : > { %v2105_v35 = vrot.slane %v967_v10, %v3537_v56 }
 0x1e7   : > { %v808_v62 = vpop.xlane.xlu0 %807  ;;  %v2026_v29 = vrot.slane %v951_v0, %v3537_v56 }
 0x1e8   : > { %v968_v8 = vmul.f32 0.020408163, %v808_v62  ;;  %v760_v33 = vpop.xlane.xlu1 %759  ;;  %v2106_v41 = vsel %vm1392_vm14, %v2105_v35, %v2101_v25 }
 0x1e9   : > { %v952_v40 = vmul.f32 0.020408163, %v760_v33  ;;  %v2027_v13 = vsel %vm1392_vm14, %v2026_v29, %v2022_v3 }
 0x1ea   : > { %v2110_v55 = vrot.slane %v968_v8, %v3557_v18 }
 0x1eb   : > { %v2031_v9 = vrot.slane %v952_v40, %v3557_v18  ;;  %v2189_v18 = vadd.f32 %v4383_v32, %v1129_v15 }
 0x1ec   : > { %v2111_v56 = vsel %vm1399_vm15, %v2110_v55, %v2106_v41 }
 0x1ed   : > { %2466 = vmatprep.mubr.f32.mxu0 %v2111_v56  ;;  %v2032_v34 = vsel %vm1399_vm15, %v2031_v9, %v2027_v13 }
 0x1ee   : > { %2467 = vmatmul.mubr.f32.vlgmr.msra.gmra.mrb[4].mxu0 %v2032_v34 }
 0x238   : > { %v2616_v45 = vpop.f32.mrb[0].mxu1 }
 0x239   : > { %v2617_v38 = vpop.f32.mrb[1].mxu1 }
 0x23a   : > { %v2618_v16 = vadd.f32 %v2617_v38, %v2616_v45 }
 0x23c   : > { %v2259_v23 = vadd.f32 %v2618_v16, %v2189_v18 }
 0x241   : > { %v2651_v27 = vpop.f32.mrb[2].mxu0 }
 0x242   : > { %v2652_v60 = vpop.f32.mrb[3].mxu0 }
 0x243   : > { %v2653_v6 = vadd.f32 %v2652_v60, %v2651_v27 }
 0x245   : > { %v2329_v57 = vadd.f32 %v2653_v6, %v2259_v23 }
 0x2b8   : > { %v2686_v39 = vpop.f32.mrb[2].mxu1 }
 0x2b9   : > { %v2687_v1 = vpop.f32.mrb[3].mxu1 }
 0x2ba   : > { %v2688_v51 = vadd.f32 %v2687_v1, %v2686_v39 }
 0x2bc   : > { %v2399_v31 = vadd.f32 %v2688_v51, %v2329_v57 }
 0x2c1   : > { %v2721_v12 = vpop.f32.mrb[4].mxu0 }
 0x2c2   : > { %v2722_v47 = vpop.f32.mrb[5].mxu0 }
 0x2c3   : > { %v2723_v21 = vadd.f32 %v2722_v47, %v2721_v12 }
 0x2c5   : > { %v2469_v28 = vadd.f32 %v2723_v21, %v2399_v31 }
 0x2c7   : > { %2472 = vst [vmem:[%s162_s19] sm:$0x1] %v2469_v28 }
 0x2c8   : > { %2937 = shalt.err (!%p2934_p3)
}
 0x2c9   : > { %s2938_s4 = scalar_lea.hbm %s4496_s25, 16  ;;  %s2942_s7 = scalar_lea.hbm %s4541_s3, 32 }
 0x2ca   : > { %p2939_p4 = scmp.ne.s32.totalorder %s4496_s25, %s2938_s4  ;;  %p2943_p9 = scmp.lt.u32.totalorder %s4496_s25, %s4541_s3 }
 0x2cb   : > { %p2944_p10 = scmp.lt.u32.totalorder %s2942_s7, %s2938_s4  ;;  %p2946_p12 = scmp.lt.u32.totalorder %s2938_s4, %s4496_s25 }
 0x2cc   : > { %p2940_p7 = pnand %p2939_p4, %p3047_p5 }
 0x2cd   : > { %p2945_p11 = por %p2944_p10, %p2943_p9 }
 0x2ce   : > { %p2941_p8 = pneg %p2940_p7 }
 0x2cf   : > { %p2947_p13 = por %p2946_p12, %p2945_p11 }
 0x2d1   : > { %p2948_p0 = pnand %p2947_p13, %p2941_p8 }
 0x2d3   : > { %2951 = shalt.err (!%p2948_p0)
}
 0x2d4   : > { %2885 = dma.vmem_to_hbm [thread:$0]  (%p3047_p5), %s4498_s20, 16, %s4496_s25, %s2474_s26  }
 0x2d5 PF: > { %p2891_p1 = scmp.ge.s32.totalorder %s2986_s15, 2  ;;  %s2498_s10 = sand.u32 1, %s2974_s12  }
 0x2d6   : > { %s2499_s11 = scalar_lea.sflag [#allocation3], %s2498_s10 }
 0x2d7   : > { %p2888_p2 = pnand %p2891_p1, %p3051_p6 }
 0x2d9   : > { %2969 = dma.done.wait (!%p2888_p2), %s2499_s11, 16  }
 0x2da   : > { %2971 = vsyncadd (!%p2888_p2), %s2499_s11, 4294967280  ;;  %p13_p3 = scmp.ge.s32.totalorder %s3034_s18, 4   ;;  %s4556_s12 = smov %s2978_s13 }
 0x2db   : > { %s4557_s13 = smov %s2982_s14  ;;  %s4558_s14 = smov %s3045_s21 }
 0x2dc   : > { %s4559_s15 = smov %s3034_s18  ;;  %15 = sbr.rel (!%p13_p3) target bundleno = 3 (0x3), region = 67 }
 0x2e3   :  { %2503 = vsyncpa [#allocation3], 1 }
 0x2e4   :  { %2505 = vsyncpa [#allocation3 + $0x1], 1 }

</bundles_post_ra>
